<compile_context>
chip_gen: v6e
topology: v6e:2x2x1
jax: 0.10.0
libtpu: 0.0.40
codegen_flags: <defaults>
</compile_context>

<pallas_src>
import functools

import jax
import jax.numpy as jnp
from jax.experimental import pallas as pl
from jax.experimental.pallas import tpu as pltpu


# ---------------------------------------------------------------------------
# Generation / resource helpers (wrapper-side, pure Python)
# ---------------------------------------------------------------------------

def _tpu_target():
    """Return (generation or None, has_two_tensorcores) for the default device."""
    try:
        kind = jax.devices()[0].device_kind.lower()
    except Exception:  # pragma: no cover - defensive
        return None, False
    gen = None
    for g in (7, 6, 5, 4, 3, 2):
        if str(g) in kind:
            gen = g
            break
    # v7x exposes 2 TensorCores per chip; v4 / v5p are megacore (2 TCs behind
    # one device). v5e / v6e are single-TC — do NOT split the grid for them.
    two_cores = (gen == 7) or ("v4" in kind) or ("v5p" in kind)
    return gen, two_cores


def _vreg_padded_bytes(rows, lanes, itemsize=4):
    """f32 bytes of a (rows, lanes) tile after (8, 128) sublane/lane padding."""
    return (-(-rows // 8) * 8) * (-(-lanes // 128) * 128) * itemsize


def _per_batch_vmem_bytes(seq_len, c, n_w, n_units, win_size, lane_pack):
    """Rough per-batch-element VMEM footprint of one grid step (f32, padded)."""
    p = _vreg_padded_bytes
    return (
        2 * p(seq_len, c)                    # x block (double-buffered by pipeline)
        + 2 * p(n_w, c)                      # out block (double-buffered)
        + p(seq_len, 2 * n_units)            # fused qry|key projection
        + p(n_w, n_units)                    # centered qry + bias
        + 3 * p(n_w, lane_pack * n_units)    # packed key / tanh / v-weighted tiles
        + (win_size + 3) * p(n_w, 1)         # per-offset scores, max, denom, exp
        + p(n_w, c)                          # weighted accumulator
    )


def _pick_batch_block(n_batch, per_batch_bytes, fixed_bytes, budget_bytes, min_steps):
    """Largest batch divisor that fits the VMEM budget and keeps >= min_steps."""
    divisors = [d for d in range(1, n_batch + 1) if n_batch % d == 0]
    fits = [d for d in divisors if fixed_bytes + d * per_batch_bytes <= budget_bytes] or [1]
    pref = [d for d in fits if n_batch // d >= min_steps] or fits
    # NOTE: for prime batch sizes this degenerates to 1 or N (perf cliff only).
    return pref[-1]


# ---------------------------------------------------------------------------
# Kernel
# ---------------------------------------------------------------------------

def _smoother_kernel(x_ref, wqk_ref, vt_ref, b_ref, out_ref, *,
                     win_size: int, n_w: int, n_units: int, lane_pack: int):
    bb, seq_len, c = x_ref.shape
    u = n_units
    x = x_ref[...].astype(jnp.float32)        # (B, L, C)
    wqk = wqk_ref[...]                        # (C, 2U)   fused [Wq | Wk]
    v_t = vt_ref[...]                         # (1, lane_pack*U)  v tiled lane_pack times
    bias = b_ref[...]                         # (1, U)

    # ---- fused projection  proj = x @ [Wq | Wk]  ->  (B, L, 2U) ----
    if c >= 32:
        # Production-sized C: one big MXU matmul. (L multiple of 8 keeps the
        # (B,L,C)->(B*L,C) merge layout-neutral.)
        proj = jnp.dot(x.reshape(bb * seq_len, c), wqk,
                       preferred_element_type=jnp.float32)
        proj = proj.reshape(bb, seq_len, 2 * u)
    else:
        # Tiny C (C=4 here): C broadcast-FMAs on the VPU beat a K=C-underfilled
        # MXU pass and avoid the in-kernel reshapes entirely.
        proj = x[:, :, 0:1] * wqk[0:1, :]
        for ci in range(1, c):
            proj = proj + x[:, :, ci:ci + 1] * wqk[ci:ci + 1, :]
    qry_all = proj[:, :, :u]                  # (B, L, U)
    key_all = proj[:, :, u:]                  # (B, L, U)

    half = win_size // 2
    # Bias hoisted out of the window loop (JAX does not CSE broadcasts).
    qry_b = qry_all[:, half:half + n_w] + bias              # (B, n_w, U)

    # ---- scores: s_j = v . tanh(qry_ctr + key[w+j] + b) ----
    # Pack `lane_pack` window offsets along the lane axis so the single-issue
    # EUP (tanh) and the VPU multiply run at 128-lane occupancy, not U/128.
    if lane_pack > 1:
        q_full = jnp.concatenate([qry_b] * lane_pack, axis=-1)   # built once
    else:
        q_full = qry_b
    scores = []                                                  # win_size x (B, n_w, 1)
    for j0 in range(0, win_size, lane_pack):
        gl = min(lane_pack, win_size - j0)
        if gl > 1:
            key_pack = jnp.concatenate(
                [key_all[:, j0 + t:j0 + t + n_w] for t in range(gl)], axis=-1)
        else:
            key_pack = key_all[:, j0:j0 + n_w]
        q_pack = q_full[:, :, :gl * u]
        th = jnp.tanh(key_pack + q_pack)                         # EUP, gl*U lanes live
        sv = th * v_t[:, :gl * u]                                # VPU
        for t in range(gl):
            scores.append(jnp.sum(sv[:, :, t * u:(t + 1) * u],
                                  axis=-1, keepdims=True))       # XLU lane reduce
    # NOTE: the window slices start at offsets 0..win-1 (not sublane-aligned); a
    # pltpu.roll-based variant would avoid any relayout copies, but the XLU has
    # slack at these shapes so the simpler slices are kept.

    # ---- fused softmax + weighted accumulate (single pass over the window) ----
    m = scores[0]
    for s in scores[1:]:
        m = jnp.maximum(m, s)
    denom = jnp.zeros_like(m)
    acc = jnp.zeros((bb, n_w, c), jnp.float32)
    for j in range(win_size):
        e = jnp.exp(scores[j] - m)                               # (B, n_w, 1)
        denom = denom + e
        acc = acc + e * x[:, j:j + n_w]                          # (B, n_w, C)
    inv = 1.0 / denom                                            # exact: parity with torch
    # TODO(synk): for large n_w*C present a lane-dense (flattened) out_spec; at
    # C=4 the masked partial stores are negligible.
    out_ref[...] = (acc * inv).astype(out_ref.dtype)


# ---------------------------------------------------------------------------
# Wrapper
# ---------------------------------------------------------------------------

def smoother_forward(x, wq, wk, v, b, win_size):
    """x: (N, L, C); wq/wk: (C, U); v: (1, U); b: (1, U). Returns (N, L-win+1, C)."""
    n_batch, seq_len, c = x.shape
    n_units = wq.shape[1]
    n_w = seq_len - win_size + 1

    # Lane-packing factor for the tanh/score path.
    lane_pack = 128 // n_units if (n_units <= 128 and 128 % n_units == 0) else 1
    lane_pack = max(1, min(lane_pack, win_size))

    gen, two_cores = _tpu_target()
    # Scoped-VMEM limit: v7x has 64 MiB physical per TC (stay well below);
    # v5e/v6e have 128 MiB. Unknown device -> conservative.
    vmem_limit = (40 << 20) if (gen == 7 or gen is None) else (64 << 20)
    block_budget = vmem_limit - (8 << 20)        # headroom for compiler scratch

    per_batch = _per_batch_vmem_bytes(seq_len, c, n_w, n_units, win_size, lane_pack)
    fixed = 2 * (_vreg_padded_bytes(c, 2 * n_units)
                 + _vreg_padded_bytes(1, lane_pack * n_units)
                 + _vreg_padded_bytes(1, n_units))
    # >=2 grid steps only where there are 2 TensorCores to shard onto; on
    # 1-TC chips one big step avoids paying the ~0.35us step overhead twice.
    min_steps = 2 if two_cores else 1
    b_blk = _pick_batch_block(n_batch, per_batch, fixed, block_budget, min_steps)
    grid = n_batch // b_blk

    # Fuse / cast weights once in the wrapper (never per grid step).
    wqk = jnp.concatenate([wq, wk], axis=1).astype(jnp.float32)        # (C, 2U)
    v_t = jnp.tile(v.reshape(1, n_units).astype(jnp.float32), (1, lane_pack))
    b32 = b.reshape(1, n_units).astype(jnp.float32)
    # TODO(synk): on v6e/v7x a bf16 cast of x/wqk (f32 accumulation) would halve
    # vreg traffic; kept f32 everywhere for exact parity with the PyTorch module
    # (and because v5e has no bf16 VPU/EUP).

    kernel = functools.partial(_smoother_kernel, win_size=win_size, n_w=n_w,
                               n_units=n_units, lane_pack=lane_pack)

    return pl.pallas_call(
        kernel,
        out_shape=jax.ShapeDtypeStruct((n_batch, n_w, c), x.dtype),
        grid=(grid,),
        in_specs=[
            pl.BlockSpec((b_blk, seq_len, c), lambda n: (n, 0, 0)),          # x block
            pl.BlockSpec((c, 2 * n_units), lambda n: (0, 0)),                # fused W
            pl.BlockSpec((1, lane_pack * n_units), lambda n: (0, 0)),        # v tiled
            pl.BlockSpec((1, n_units), lambda n: (0, 0)),                    # bias
        ],
        out_specs=pl.BlockSpec((b_blk, n_w, c), lambda n: (n, 0, 0)),
        compiler_params=pltpu.CompilerParams(
            dimension_semantics=("parallel",),
            vmem_limit_bytes=vmem_limit),
    )(x, wqk, v_t, b32)


# ---------------------------------------------------------------------------
# Pure-JAX reference (matches the PyTorch forward exactly)
# ---------------------------------------------------------------------------

def smoother_reference(x, wq, wk, v, b, win_size):
    n_batch, seq_len, c = x.shape
    n_w = seq_len - win_size + 1
    idx = jnp.arange(n_w)[:, None] + jnp.arange(win_size)[None, :]     # (n_w, win)
    x_win = x[:, idx]                                                  # (N, n_w, win, C)
    x_ctr = x[:, win_size // 2: win_size // 2 + n_w][:, :, None, :]    # (N, n_w, 1, C)
    key = x_win @ wk                                                   # (N, n_w, win, U)
    qry = x_ctr @ wq                                                   # (N, n_w, 1, U)
    score = jnp.tanh(qry + key + b.reshape(1, 1, 1, -1)) @ v.reshape(-1, 1)
    weight = jax.nn.softmax(score, axis=2)                             # over window
    return (x_win * weight).sum(axis=2)                                # (N, n_w, C)


if __name__ == "__main__":
    # Module config: in_channels=4, n_units=32, win_size=5; batch=4, seq=16.
    N, L, C, U, WIN = 4, 16, 4, 32, 5

    key = jax.random.PRNGKey(0)
    kx, kq, kk, kv, kb = jax.random.split(key, 5)

    x = jax.random.normal(kx, (N, L, C), dtype=jnp.float32)
    # torch Linear stores (out, in); we keep the transposed (in, out) layout
    # for W_qry/W_key, and v as the torch (1, U) weight directly.
    wq = jax.random.normal(kq, (C, U), dtype=jnp.float32) * 0.1   # W_qry^T
    wk = jax.random.normal(kk, (C, U), dtype=jnp.float32) * 0.1   # W_key^T
    v = jax.random.normal(kv, (1, U), dtype=jnp.float32) * 0.1    # v weight
    b = jax.random.normal(kb, (1, U), dtype=jnp.float32) * 0.1    # bias param

    out = smoother_forward(x, wq, wk, v, b, WIN)
    out = jax.block_until_ready(out)

    ref = smoother_reference(x, wq, wk, v, b, WIN)
    assert out.shape == (N, L - WIN + 1, C)
    assert jnp.allclose(out, ref, atol=1e-4, rtol=1e-4), \
        float(jnp.max(jnp.abs(out - ref)))

    print("KERNEL_OK")
</pallas_src>

<mosaic_0001>
module attributes {stable_mosaic.version = 11 : i64} {
  func.func @_smoother_kernel(%arg0: i32, %arg1: memref<4x16x4xf32, #tpu.memory_space<vmem>>, %arg2: memref<4x64xf32, #tpu.memory_space<vmem>>, %arg3: memref<1x128xf32, #tpu.memory_space<vmem>>, %arg4: memref<1x32xf32, #tpu.memory_space<vmem>>, %arg5: memref<4x12x4xf32, #tpu.memory_space<vmem>>) attributes {dimension_semantics = [#tpu.dimension_semantics<parallel>], iteration_bounds = array<i64: 1>, scalar_prefetch = 0 : i64, scratch_operands = 0 : i64, tpu.core_type = #tpu.core_type<tc>, window_params = [{transform_indices = @transform_0, window_bounds = array<i64: 4, 16, 4>}, {pipeline_mode = #tpu.pipeline_mode<synchronous>, transform_indices = @transform_1, window_bounds = array<i64: 4, 64>}, {pipeline_mode = #tpu.pipeline_mode<synchronous>, transform_indices = @transform_2, window_bounds = array<i64: 1, 128>}, {pipeline_mode = #tpu.pipeline_mode<synchronous>, transform_indices = @transform_3, window_bounds = array<i64: 1, 32>}, {transform_indices = @transform_4, window_bounds = array<i64: 4, 12, 4>}]} {
    %c0 = arith.constant 0 : index
    %c0_0 = arith.constant 0 : index
    %c0_1 = arith.constant 0 : index
    %0 = vector.load %arg1[%c0, %c0_0, %c0_1] : memref<4x16x4xf32, #tpu.memory_space<vmem>>, vector<4x16x4xf32>
    %c0_2 = arith.constant 0 : index
    %c0_3 = arith.constant 0 : index
    %1 = vector.load %arg2[%c0_2, %c0_3] : memref<4x64xf32, #tpu.memory_space<vmem>>, vector<4x64xf32>
    %c0_4 = arith.constant 0 : index
    %c0_5 = arith.constant 0 : index
    %2 = vector.load %arg3[%c0_4, %c0_5] : memref<1x128xf32, #tpu.memory_space<vmem>>, vector<1x128xf32>
    %c0_6 = arith.constant 0 : index
    %c0_7 = arith.constant 0 : index
    %3 = vector.load %arg4[%c0_6, %c0_7] : memref<1x32xf32, #tpu.memory_space<vmem>>, vector<1x32xf32>
    %4 = vector.extract_strided_slice %0 {offsets = [0, 0, 0], sizes = [4, 16, 1], strides = [1, 1, 1]} : vector<4x16x4xf32> to vector<4x16x1xf32>
    %5 = vector.extract_strided_slice %1 {offsets = [0, 0], sizes = [1, 64], strides = [1, 1]} : vector<4x64xf32> to vector<1x64xf32>
    %6 = vector.shape_cast %5 : vector<1x64xf32> to vector<1x1x64xf32>
    %7 = vector.broadcast %4 : vector<4x16x1xf32> to vector<4x16x64xf32>
    %8 = vector.broadcast %6 : vector<1x1x64xf32> to vector<4x16x64xf32>
    %9 = arith.mulf %7, %8 : vector<4x16x64xf32>
    %10 = vector.extract_strided_slice %0 {offsets = [0, 0, 1], sizes = [4, 16, 1], strides = [1, 1, 1]} : vector<4x16x4xf32> to vector<4x16x1xf32>
    %11 = vector.extract_strided_slice %1 {offsets = [1, 0], sizes = [1, 64], strides = [1, 1]} : vector<4x64xf32> to vector<1x64xf32>
    %12 = vector.shape_cast %11 : vector<1x64xf32> to vector<1x1x64xf32>
    %13 = vector.broadcast %10 : vector<4x16x1xf32> to vector<4x16x64xf32>
    %14 = vector.broadcast %12 : vector<1x1x64xf32> to vector<4x16x64xf32>
    %15 = arith.mulf %13, %14 : vector<4x16x64xf32>
    %16 = arith.addf %9, %15 : vector<4x16x64xf32>
    %17 = vector.extract_strided_slice %0 {offsets = [0, 0, 2], sizes = [4, 16, 1], strides = [1, 1, 1]} : vector<4x16x4xf32> to vector<4x16x1xf32>
    %18 = vector.extract_strided_slice %1 {offsets = [2, 0], sizes = [1, 64], strides = [1, 1]} : vector<4x64xf32> to vector<1x64xf32>
    %19 = vector.shape_cast %18 : vector<1x64xf32> to vector<1x1x64xf32>
    %20 = vector.broadcast %17 : vector<4x16x1xf32> to vector<4x16x64xf32>
    %21 = vector.broadcast %19 : vector<1x1x64xf32> to vector<4x16x64xf32>
    %22 = arith.mulf %20, %21 : vector<4x16x64xf32>
    %23 = arith.addf %16, %22 : vector<4x16x64xf32>
    %24 = vector.extract_strided_slice %0 {offsets = [0, 0, 3], sizes = [4, 16, 1], strides = [1, 1, 1]} : vector<4x16x4xf32> to vector<4x16x1xf32>
    %25 = vector.extract_strided_slice %1 {offsets = [3, 0], sizes = [1, 64], strides = [1, 1]} : vector<4x64xf32> to vector<1x64xf32>
    %26 = vector.shape_cast %25 : vector<1x64xf32> to vector<1x1x64xf32>
    %27 = vector.broadcast %24 : vector<4x16x1xf32> to vector<4x16x64xf32>
    %28 = vector.broadcast %26 : vector<1x1x64xf32> to vector<4x16x64xf32>
    %29 = arith.mulf %27, %28 : vector<4x16x64xf32>
    %30 = arith.addf %23, %29 : vector<4x16x64xf32>
    %31 = vector.extract_strided_slice %30 {offsets = [0, 0, 0], sizes = [4, 16, 32], strides = [1, 1, 1]} : vector<4x16x64xf32> to vector<4x16x32xf32>
    %32 = vector.extract_strided_slice %30 {offsets = [0, 0, 32], sizes = [4, 16, 32], strides = [1, 1, 1]} : vector<4x16x64xf32> to vector<4x16x32xf32>
    %33 = vector.extract_strided_slice %31 {offsets = [0, 2, 0], sizes = [4, 12, 32], strides = [1, 1, 1]} : vector<4x16x32xf32> to vector<4x12x32xf32>
    %34 = vector.shape_cast %3 : vector<1x32xf32> to vector<1x1x32xf32>
    %35 = vector.broadcast %34 : vector<1x1x32xf32> to vector<4x12x32xf32>
    %36 = arith.addf %33, %35 : vector<4x12x32xf32>
    %37 = tpu.concatenate %36, %36, %36, %36 in 2 : vector<4x12x32xf32>, vector<4x12x32xf32>, vector<4x12x32xf32>, vector<4x12x32xf32> -> vector<4x12x128xf32>
    %38 = vector.extract_strided_slice %32 {offsets = [0, 0, 0], sizes = [4, 12, 32], strides = [1, 1, 1]} : vector<4x16x32xf32> to vector<4x12x32xf32>
    %39 = vector.extract_strided_slice %32 {offsets = [0, 1, 0], sizes = [4, 12, 32], strides = [1, 1, 1]} : vector<4x16x32xf32> to vector<4x12x32xf32>
    %40 = vector.extract_strided_slice %32 {offsets = [0, 2, 0], sizes = [4, 12, 32], strides = [1, 1, 1]} : vector<4x16x32xf32> to vector<4x12x32xf32>
    %41 = vector.extract_strided_slice %32 {offsets = [0, 3, 0], sizes = [4, 12, 32], strides = [1, 1, 1]} : vector<4x16x32xf32> to vector<4x12x32xf32>
    %42 = tpu.concatenate %38, %39, %40, %41 in 2 : vector<4x12x32xf32>, vector<4x12x32xf32>, vector<4x12x32xf32>, vector<4x12x32xf32> -> vector<4x12x128xf32>
    %43 = arith.addf %42, %37 : vector<4x12x128xf32>
    %44 = math.tanh %43 : vector<4x12x128xf32>
    %45 = vector.shape_cast %2 : vector<1x128xf32> to vector<1x1x128xf32>
    %46 = vector.broadcast %45 : vector<1x1x128xf32> to vector<4x12x128xf32>
    %47 = arith.mulf %44, %46 : vector<4x12x128xf32>
    %48 = vector.extract_strided_slice %47 {offsets = [0, 0, 0], sizes = [4, 12, 32], strides = [1, 1, 1]} : vector<4x12x128xf32> to vector<4x12x32xf32>
    %cst = arith.constant dense<0.000000e+00> : vector<4x12xf32>
    %49 = vector.multi_reduction <add>, %48, %cst [2] : vector<4x12x32xf32> to vector<4x12xf32>
    %50 = vector.shape_cast %49 : vector<4x12xf32> to vector<4x12x1xf32>
    %51 = vector.extract_strided_slice %47 {offsets = [0, 0, 32], sizes = [4, 12, 32], strides = [1, 1, 1]} : vector<4x12x128xf32> to vector<4x12x32xf32>
    %cst_8 = arith.constant dense<0.000000e+00> : vector<4x12xf32>
    %52 = vector.multi_reduction <add>, %51, %cst_8 [2] : vector<4x12x32xf32> to vector<4x12xf32>
    %53 = vector.shape_cast %52 : vector<4x12xf32> to vector<4x12x1xf32>
    %54 = vector.extract_strided_slice %47 {offsets = [0, 0, 64], sizes = [4, 12, 32], strides = [1, 1, 1]} : vector<4x12x128xf32> to vector<4x12x32xf32>
    %cst_9 = arith.constant dense<0.000000e+00> : vector<4x12xf32>
    %55 = vector.multi_reduction <add>, %54, %cst_9 [2] : vector<4x12x32xf32> to vector<4x12xf32>
    %56 = vector.shape_cast %55 : vector<4x12xf32> to vector<4x12x1xf32>
    %57 = vector.extract_strided_slice %47 {offsets = [0, 0, 96], sizes = [4, 12, 32], strides = [1, 1, 1]} : vector<4x12x128xf32> to vector<4x12x32xf32>
    %cst_10 = arith.constant dense<0.000000e+00> : vector<4x12xf32>
    %58 = vector.multi_reduction <add>, %57, %cst_10 [2] : vector<4x12x32xf32> to vector<4x12xf32>
    %59 = vector.shape_cast %58 : vector<4x12xf32> to vector<4x12x1xf32>
    %60 = vector.extract_strided_slice %32 {offsets = [0, 4, 0], sizes = [4, 12, 32], strides = [1, 1, 1]} : vector<4x16x32xf32> to vector<4x12x32xf32>
    %61 = vector.extract_strided_slice %37 {offsets = [0, 0, 0], sizes = [4, 12, 32], strides = [1, 1, 1]} : vector<4x12x128xf32> to vector<4x12x32xf32>
    %62 = arith.addf %60, %61 : vector<4x12x32xf32>
    %63 = math.tanh %62 : vector<4x12x32xf32>
    %64 = vector.extract_strided_slice %2 {offsets = [0, 0], sizes = [1, 32], strides = [1, 1]} : vector<1x128xf32> to vector<1x32xf32>
    %65 = vector.shape_cast %64 : vector<1x32xf32> to vector<1x1x32xf32>
    %66 = vector.broadcast %65 : vector<1x1x32xf32> to vector<4x12x32xf32>
    %67 = arith.mulf %63, %66 : vector<4x12x32xf32>
    %cst_11 = arith.constant dense<0.000000e+00> : vector<4x12xf32>
    %68 = vector.multi_reduction <add>, %67, %cst_11 [2] : vector<4x12x32xf32> to vector<4x12xf32>
    %69 = vector.shape_cast %68 : vector<4x12xf32> to vector<4x12x1xf32>
    %70 = arith.maximumf %50, %53 : vector<4x12x1xf32>
    %71 = arith.maximumf %70, %56 : vector<4x12x1xf32>
    %72 = arith.maximumf %71, %59 : vector<4x12x1xf32>
    %73 = arith.maximumf %72, %69 : vector<4x12x1xf32>
    %cst_12 = arith.constant 0.000000e+00 : f32
    %74 = vector.broadcast %cst_12 : f32 to vector<4x12x1xf32>
    %cst_13 = arith.constant 0.000000e+00 : f32
    %75 = vector.broadcast %cst_13 : f32 to vector<4x12x4xf32>
    %76 = arith.subf %50, %73 : vector<4x12x1xf32>
    %77 = math.exp %76 : vector<4x12x1xf32>
    %78 = arith.addf %74, %77 : vector<4x12x1xf32>
    %79 = vector.extract_strided_slice %0 {offsets = [0, 0, 0], sizes = [4, 12, 4], strides = [1, 1, 1]} : vector<4x16x4xf32> to vector<4x12x4xf32>
    %80 = vector.broadcast %77 : vector<4x12x1xf32> to vector<4x12x4xf32>
    %81 = arith.mulf %80, %79 : vector<4x12x4xf32>
    %82 = arith.addf %75, %81 : vector<4x12x4xf32>
    %83 = arith.subf %53, %73 : vector<4x12x1xf32>
    %84 = math.exp %83 : vector<4x12x1xf32>
    %85 = arith.addf %78, %84 : vector<4x12x1xf32>
    %86 = vector.extract_strided_slice %0 {offsets = [0, 1, 0], sizes = [4, 12, 4], strides = [1, 1, 1]} : vector<4x16x4xf32> to vector<4x12x4xf32>
    %87 = vector.broadcast %84 : vector<4x12x1xf32> to vector<4x12x4xf32>
    %88 = arith.mulf %87, %86 : vector<4x12x4xf32>
    %89 = arith.addf %82, %88 : vector<4x12x4xf32>
    %90 = arith.subf %56, %73 : vector<4x12x1xf32>
    %91 = math.exp %90 : vector<4x12x1xf32>
    %92 = arith.addf %85, %91 : vector<4x12x1xf32>
    %93 = vector.extract_strided_slice %0 {offsets = [0, 2, 0], sizes = [4, 12, 4], strides = [1, 1, 1]} : vector<4x16x4xf32> to vector<4x12x4xf32>
    %94 = vector.broadcast %91 : vector<4x12x1xf32> to vector<4x12x4xf32>
    %95 = arith.mulf %94, %93 : vector<4x12x4xf32>
    %96 = arith.addf %89, %95 : vector<4x12x4xf32>
    %97 = arith.subf %59, %73 : vector<4x12x1xf32>
    %98 = math.exp %97 : vector<4x12x1xf32>
    %99 = arith.addf %92, %98 : vector<4x12x1xf32>
    %100 = vector.extract_strided_slice %0 {offsets = [0, 3, 0], sizes = [4, 12, 4], strides = [1, 1, 1]} : vector<4x16x4xf32> to vector<4x12x4xf32>
    %101 = vector.broadcast %98 : vector<4x12x1xf32> to vector<4x12x4xf32>
    %102 = arith.mulf %101, %100 : vector<4x12x4xf32>
    %103 = arith.addf %96, %102 : vector<4x12x4xf32>
    %104 = arith.subf %69, %73 : vector<4x12x1xf32>
    %105 = math.exp %104 : vector<4x12x1xf32>
    %106 = arith.addf %99, %105 : vector<4x12x1xf32>
    %107 = vector.extract_strided_slice %0 {offsets = [0, 4, 0], sizes = [4, 12, 4], strides = [1, 1, 1]} : vector<4x16x4xf32> to vector<4x12x4xf32>
    %108 = vector.broadcast %105 : vector<4x12x1xf32> to vector<4x12x4xf32>
    %109 = arith.mulf %108, %107 : vector<4x12x4xf32>
    %110 = arith.addf %103, %109 : vector<4x12x4xf32>
    %cst_14 = arith.constant 1.000000e+00 : f32
    %111 = vector.broadcast %cst_14 : f32 to vector<4x12x1xf32>
    %112 = arith.divf %111, %106 : vector<4x12x1xf32>
    %113 = vector.broadcast %112 : vector<4x12x1xf32> to vector<4x12x4xf32>
    %114 = arith.mulf %110, %113 : vector<4x12x4xf32>
    %c0_15 = arith.constant 0 : index
    %c0_16 = arith.constant 0 : index
    %c0_17 = arith.constant 0 : index
    %115 = vector.load %arg5[%c0_15, %c0_16, %c0_17] : memref<4x12x4xf32, #tpu.memory_space<vmem>>, vector<4x12x4xf32>
    tpu.vector_store %arg5[%c0_15, %c0_16, %c0_17], %114 {strides = array<i32>} : memref<4x12x4xf32, #tpu.memory_space<vmem>>, vector<4x12x4xf32>,
    return
  }
  func.func @transform_0(%arg0: i32) -> (i32, i32, i32) {
    %c0_i32 = arith.constant 0 : i32
    %c0_i32_0 = arith.constant 0 : i32
    %c0_i32_1 = arith.constant 0 : i32
    return %arg0, %c0_i32, %c0_i32_0 : i32, i32, i32
  }
  func.func @transform_1(%arg0: i32) -> (i32, i32) {
    %c0_i32 = arith.constant 0 : i32
    %c0_i32_0 = arith.constant 0 : i32
    %c0_i32_1 = arith.constant 0 : i32
    return %c0_i32, %c0_i32_0 : i32, i32
  }
  func.func @transform_2(%arg0: i32) -> (i32, i32) {
    %c0_i32 = arith.constant 0 : i32
    %c0_i32_0 = arith.constant 0 : i32
    %c0_i32_1 = arith.constant 0 : i32
    return %c0_i32, %c0_i32_0 : i32, i32
  }
  func.func @transform_3(%arg0: i32) -> (i32, i32) {
    %c0_i32 = arith.constant 0 : i32
    %c0_i32_0 = arith.constant 0 : i32
    %c0_i32_1 = arith.constant 0 : i32
    return %c0_i32, %c0_i32_0 : i32, i32
  }
  func.func @transform_4(%arg0: i32) -> (i32, i32, i32) {
    %c0_i32 = arith.constant 0 : i32
    %c0_i32_0 = arith.constant 0 : i32
    %c0_i32_1 = arith.constant 0 : i32
    return %arg0, %c0_i32, %c0_i32_0 : i32, i32, i32
  }
}

</mosaic_0001>

<bundles_post_ra>
// kernel: tpu_custom_call.1
= control target key start
LH: loop header
LB: loop body
LE: loop exit
PB: predicated region body
PF: predicated region fallthrough
CT: control target
= control target key end

     0   :  { %v1733_v0 = vmov 1   ;;  %v1734_v1 = vmov 0   ;;  %v1735_v8 = vmov 2   ;;  %v1736_v11 = vmov 3   ;;  %s1738_s9 = smov 32   ;;  %s2782_s0 = inlined_call_operand.vmem [shape: f32[4,16,4], index: 0, kind: input, shape index: {}]   ;;  %s2783_s1 = inlined_call_operand.vmem [shape: f32[4,64], index: 1, kind: input, shape index: {}]   ;;  %s2784_s3 = inlined_call_operand.vmem [shape: f32[1,32], index: 3, kind: input, shape index: {}]   ;;  %s2785_s2 = inlined_call_operand.vmem [shape: f32[1,128], index: 2, kind: input, shape index: {}]   ;;  %s2786_s4 = inlined_call_operand.vmem [shape: f32[4,12,4], index: 4, kind: output, shape index: {}]  }
   0x1   :  { %1589 = vset.pattern.permute.xlu0 %v1733_v0  ;;  %1588 = vset.pattern.permute.xlu1 %v1734_v1  ;;  %v19_v2 = vld [vmem:[%s2782_s0 + $0x10] sm:$0xff]  ;;  %v17_v3 = vld [vmem:[%s2782_s0] sm:$0xff]  ;;  %v20_v4 = vld [vmem:[%s2782_s0 + $0x18] sm:$0xff]  ;;  %v68_v28 = vlaneseq  ;;  %vm410_vm0 = vcmask 1045504   ;;  %vm447_vm1 = vcmask 1044480   ;;  %vm339_vm2 = vcmask 523264  }
   0x2   :  { %40 = vperm.xlu1 %1588, %v19_v2   ;;  %81 = vperm.xlu0 %1589, %v17_v3   ;;  %v22_v5 = vld [vmem:[%s2782_s0 + $0x28] sm:$0xff]  ;;  %v24_v6 = vld [vmem:[%s2782_s0 + $0x38] sm:$0xff]  ;;  %v21_v9 = vld [vmem:[%s2782_s0 + $0x20] sm:$0xff]  ;;  %vm330_vm3 = vcmask 261120   ;;  %vm348_vm4 = vcmask 785408   ;;  %vm743_vm5 = vcmask 1041408  }
   0x3   :  { %v18_v7 = vld [vmem:[%s2782_s0 + $0x8] sm:$0xff]  ;;  %v23_v10 = vld [vmem:[%s2782_s0 + $0x30] sm:$0xff]  ;;  %v69_v31 = vshrl.u32 %v68_v28, 7  ;;  %v25_v35 = vld [vmem:[%s2783_s1] sm:$0xf]  ;;  %s1737_s1 = smov 96  }
   0x4   :  { %vm389_vm6 = vcmask 1046528   ;;  %vm569_vm7 = vcmask 257024   ;;  %vm839_vm8 = vcmask 261124   ;;  %vm896_vm9 = vcmask 1043456  }
   0x5   :  { %v114_v34 = vsub.s32 1, %v69_v31  ;;  %v70_v36 = vsub.s32 0, %v69_v31  ;;  %v166_v40 = vsub.s32 2, %v69_v31  ;;  %v218_v41 = vsub.s32 3, %v69_v31 }
   0x6   :  { %45 = vperm.xlu1 %1588, %v20_v4   ;;  %93 = vperm.xlu0 %1589, %v20_v4   ;;  %vm1565_vm10 = vcmask 31744   ;;  %vm1567_vm11 = vcmask 27648  }
   0x7   :  { %v115_v39 = vrot.slane %v25_v35, %v114_v34  ;;  %v71_v42 = vrot.slane %v25_v35, %v70_v36  ;;  %v167_v46 = vrot.slane %v25_v35, %v166_v40  ;;  %v1806_v47 = vrot.slane %v25_v35, %v218_v41 }
   0xa   :  { %55 = vperm.xlu1 %1588, %v22_v5   ;;  %101 = vperm.xlu0 %1589, %v22_v5  }
   0xe   :  { %65 = vperm.xlu1 %1588, %v24_v6   ;;  %109 = vperm.xlu0 %1589, %v24_v6  }
  0x12   :  { %1590 = vset.pattern.permute.xlu1 %v1733_v0  ;;  %1592 = vset.pattern.permute.xlu0 %v1735_v8 }
  0x13   :  { %85 = vperm.xlu1 %1590, %v18_v7   ;;  %137 = vperm.xlu0 %1592, %v18_v7  }
  0x17   :  { %89 = vperm.xlu1 %1590, %v19_v2   ;;  %149 = vperm.xlu0 %1592, %v21_v9  }
  0x1b   :  { %97 = vperm.xlu1 %1590, %v21_v9   ;;  %157 = vperm.xlu0 %1592, %v23_v10  }
  0x1f   :  { %105 = vperm.xlu1 %1590, %v23_v10   ;;  %1593 = vset.pattern.permute.xlu0 %v1736_v11 }
  0x20   :  { %185 = vperm.xlu0 %1593, %v17_v3  }
  0x23   :  { %1591 = vset.pattern.permute.xlu1 %v1735_v8 }
  0x24   :  { %133 = vperm.xlu1 %1591, %v17_v3   ;;  %197 = vperm.xlu0 %1593, %v20_v4  }
  0x28   :  { %141 = vperm.xlu1 %1591, %v19_v2   ;;  %205 = vperm.xlu0 %1593, %v22_v5  }
  0x2c   :  { %145 = vperm.xlu1 %1591, %v20_v4   ;;  %213 = vperm.xlu0 %1593, %v24_v6  }
  0x30   :  { %153 = vperm.xlu1 %1591, %v22_v5   ;;  %1595 = vset.pattern.permute.xlu0 %v1734_v1 }
  0x31   :  { %30 = vperm.xlu0 %1595, %v17_v3  }
  0x34   :  { %161 = vperm.xlu1 %1591, %v24_v6  }
  0x35   :  { %35 = vperm.xlu0 %1595, %v18_v7  }
  0x38   :  { %1594 = vset.pattern.permute.xlu1 %v1736_v11 }
  0x39   :  { %189 = vperm.xlu1 %1594, %v18_v7   ;;  %50 = vperm.xlu0 %1595, %v21_v9  }
  0x3d   :  { %193 = vperm.xlu1 %1594, %v19_v2   ;;  %60 = vperm.xlu0 %1595, %v23_v10  }
  0x41   :  { %201 = vperm.xlu1 %1594, %v21_v9  }
  0x45   :  { %209 = vperm.xlu1 %1594, %v23_v10  }
  0x49   :  { %1596 = vset.pattern.permute.xlu1 %v1734_v1 }
  0x7d   :  { %v41_v12 = vpop.permute.xlu1 %40  ;;  %v82_v13 = vpop.permute.xlu0 %81 }
  0x7e   :  { %v116_v45 = vmul.f32 %v115_v39, %v82_v13  ;;  %v74_v0 = vmul.f32 %v71_v42, %v41_v12 }
  0x81   :  { %v46_v14 = vpop.permute.xlu1 %45  ;;  %v94_v15 = vpop.permute.xlu0 %93 }
  0x82   :  { %v75_v52 = vmul.f32 %v71_v42, %v46_v14  ;;  %v119_v53 = vmul.f32 %v115_v39, %v94_v15 }
  0x84   :  { %v127_v1 = vadd.f32 %v119_v53, %v75_v52 }
  0x85   :  { %v56_v16 = vpop.permute.xlu1 %55  ;;  %v102_v17 = vpop.permute.xlu0 %101 }
  0x86   :  { %v77_v2 = vmul.f32 %v71_v42, %v56_v16  ;;  %v121_v3 = vmul.f32 %v115_v39, %v102_v17 }
  0x88   :  { %v129_v12 = vadd.f32 %v121_v3, %v77_v2 }
  0x89   :  { %v1789_v18 = vpop.permute.xlu1 %65  ;;  %v1791_v19 = vpop.permute.xlu0 %109 }
  0x8a   :  { %v79_v16 = vmul.f32 %v71_v42, %v1789_v18  ;;  %v123_v17 = vmul.f32 %v115_v39, %v1791_v19 }
  0x8e   :  { %v86_v20 = vpop.permute.xlu1 %85  ;;  %v138_v21 = vpop.permute.xlu0 %137 }
  0x8f   :  { %v117_v55 = vmul.f32 %v115_v39, %v86_v20  ;;  %v169_v60 = vmul.f32 %v167_v46, %v138_v21 }
  0x92   :  { %v90_v22 = vpop.permute.xlu1 %89  ;;  %v1793_v23 = vpop.permute.xlu0 %149 }
  0x93   :  { %v118_v59 = vmul.f32 %v115_v39, %v90_v22 }
  0x95   :  { %v126_v10 = vadd.f32 %v118_v59, %v74_v0 }
  0x96   :  { %v98_v24 = vpop.permute.xlu1 %97  ;;  %v1795_v25 = vpop.permute.xlu0 %157 }
  0x97   :  { %v120_v11 = vmul.f32 %v115_v39, %v98_v24  ;;  %v172_v24 = vmul.f32 %v167_v46, %v1793_v23  ;;  %v174_v23 = vmul.f32 %v167_v46, %v1795_v25 }
  0x9a   :  { %v1797_v26 = vpop.permute.xlu1 %105 }
  0x9b   :  { %v186_v27 = vpop.permute.xlu0 %185 }
  0x9c   :  { %v220_v56 = vmul.f32 %v1806_v47, %v186_v27 }
  0x9f   :  { %v134_v29 = vpop.permute.xlu1 %133  ;;  %v198_v30 = vpop.permute.xlu0 %197 }
  0xa0   :  { %v168_v49 = vmul.f32 %v167_v46, %v134_v29  ;;  %v223_v20 = vmul.f32 %v1806_v47, %v198_v30  ;;  %v131_v30 = vadd.f32 %v123_v17, %v79_v16 }
  0xa3   :  { %v142_v32 = vpop.permute.xlu1 %141  ;;  %v1799_v33 = vpop.permute.xlu0 %205 }
  0xa4   :  { %v170_v6 = vmul.f32 %v167_v46, %v142_v32  ;;  %v122_v32 = vmul.f32 %v115_v39, %v1797_v26  ;;  %v225_v36 = vmul.f32 %v1806_v47, %v1799_v33 }
  0xa6   :  { %v178_v27 = vadd.f32 %v170_v6, %v126_v10 }
  0xa7   :  { %v146_v37 = vpop.permute.xlu1 %145  ;;  %v1804_v38 = vpop.permute.xlu0 %213 }
  0xa8   :  { %v171_v61 = vmul.f32 %v167_v46, %v146_v37  ;;  %v227_v33 = vmul.f32 %v1806_v47, %v1804_v38  ;;  %v1579_v38 = vld [vmem:[%s2784_s3] ss:$0 sm:$0xff]  ;;  %s1739_s3 = smov 64  }
  0xaa   :  { %v179_v13 = vadd.f32 %v171_v61, %v127_v1 }
  0xab   :  { %v154_v43 = vpop.permute.xlu1 %153 }
  0xac   :  { %v31_v44 = vpop.permute.xlu0 %30  ;;  %v173_v14 = vmul.f32 %v167_v46, %v154_v43  ;;  %v1824_v34 = vadd.f32 %v223_v20, %v179_v13 }
  0xad   :  { %v72_v48 = vmul.f32 %v71_v42, %v31_v44 }
  0xae   :  { %v181_v18 = vadd.f32 %v173_v14, %v129_v12 }
  0xaf   :  { %v124_v50 = vadd.f32 %v116_v45, %v72_v48  ;;  %v162_v51 = vpop.permute.xlu1 %161 }
  0xb0   :  { %v36_v54 = vpop.permute.xlu0 %35  ;;  %v175_v19 = vmul.f32 %v167_v46, %v162_v51  ;;  %v1836_v26 = vadd.f32 %v225_v36, %v181_v18 }
  0xb1   :  { %v176_v57 = vadd.f32 %v168_v49, %v124_v50  ;;  %v73_v58 = vmul.f32 %v71_v42, %v36_v54  ;;  %v1869_v50 = vadd.f32 %v1579_v38, %v1824_v34 }
  0xb2   :  { %v183_v39 = vadd.f32 %v175_v19, %v131_v30  ;;  %v1879_v52 = vadd.f32 %v1579_v38, %v1836_v26  ;;  %v418_v0 = vrot.slane %v1836_v26, 2  ;;  %v455_v13 = vrot.slane %v1836_v26, 3 }
  0xb3   :  { %v1809_v62 = vadd.f32 %v220_v56, %v176_v57  ;;  %v125_v63 = vadd.f32 %v117_v55, %v73_v58 }
  0xb4   :  { %v190_v4 = vpop.permute.xlu1 %189  ;;  %v51_v5 = vpop.permute.xlu0 %50  ;;  %v1847_v49 = vadd.f32 %v227_v33, %v183_v39 }
  0xb5   :  { %v177_v7 = vadd.f32 %v169_v60, %v125_v63  ;;  %v221_v8 = vmul.f32 %v1806_v47, %v190_v4  ;;  %v76_v9 = vmul.f32 %v71_v42, %v51_v5  ;;  %365 = vrot.lane.b32.xlu1 %v1809_v62, %s1737_s1  ;;  %v411_v57 = vrot.slane %v1809_v62, 2 }
  0xb6   :  { %v1889_v54 = vadd.f32 %v1579_v38, %v1847_v49  ;;  %v415_v60 = vrot.slane %v1824_v34, 2  ;;  %v421_v3 = vrot.slane %v1847_v49, 2  ;;  %v448_v6 = vrot.slane %v1809_v62, 3 }
  0xb7   :  { %v1814_v15 = vadd.f32 %v221_v8, %v177_v7  ;;  %v128_v28 = vadd.f32 %v120_v11, %v76_v9  ;;  %v452_v9 = vrot.slane %v1824_v34, 3  ;;  %v458_v16 = vrot.slane %v1847_v49, 3 }
  0xb8   :  { %v194_v21 = vpop.permute.xlu1 %193  ;;  %v61_v22 = vpop.permute.xlu0 %60 }
  0xb9   :  { %v222_v29 = vmul.f32 %v1806_v47, %v194_v21  ;;  %v78_v31 = vmul.f32 %v71_v42, %v61_v22  ;;  %367 = vrot.lane.b32.xlu0 %v1814_v15, %s1737_s1  ;;  %v180_v41 = vadd.f32 %v172_v24, %v128_v28  ;;  %v1859_v46 = vadd.f32 %v1579_v38, %v1814_v15 }
  0xba   :  { %v412_v56 = vrot.slane %v1814_v15, 2  ;;  %v449_v5 = vrot.slane %v1814_v15, 3 }
  0xbb   :  { %v1826_v35 = vadd.f32 %v222_v29, %v178_v27  ;;  %v130_v40 = vadd.f32 %v122_v32, %v78_v31 }
  0xbc   :  { %v202_v37 = vpop.permute.xlu1 %201  ;;  %v413_v58 = vsel %vm410_vm0, %v411_v57, %v412_v56  ;;  %v450_v7 = vsel %vm447_vm1, %v448_v6, %v449_v5 }
  0xbd   :  { %v224_v42 = vmul.f32 %v1806_v47, %v202_v37  ;;  %369 = vrot.lane.b32.xlu1 %v1826_v35, %s1737_s1  ;;  %371 = vrot.lane.b32.xlu0 %v1824_v34, %s1737_s1  ;;  %v182_v45 = vadd.f32 %v174_v23, %v130_v40  ;;  %v1872_v51 = vadd.f32 %v1579_v38, %v1826_v35  ;;  %v414_v59 = vrot.slane %v1826_v35, 2 }
  0xbe   :  { %v451_v8 = vrot.slane %v1826_v35, 3 }
  0xbf   :  { %v1838_v43 = vadd.f32 %v224_v42, %v180_v41  ;;  %v416_v61 = vsel %vm410_vm0, %v414_v59, %v415_v60 }
  0xc0   :  { %v210_v44 = vpop.permute.xlu1 %209  ;;  %v453_v10 = vsel %vm447_vm1, %v451_v8, %v452_v9 }
  0xc1   :  { %v226_v48 = vmul.f32 %v1806_v47, %v210_v44  ;;  %375 = vrot.lane.b32.xlu0 %v1836_v26, %s1737_s1  ;;  %373 = vrot.lane.b32.xlu1 %v1838_v43, %s1737_s1  ;;  %v1862_v47 = vadd.f32 %v1579_v38, %v1809_v62  ;;  %v1882_v53 = vadd.f32 %v1579_v38, %v1838_v43  ;;  %v417_v63 = vrot.slane %v1838_v43, 2 }
  0xc2   :  { %v454_v11 = vrot.slane %v1838_v43, 3 }
  0xc3   :  { %v1849_v25 = vadd.f32 %v226_v48, %v182_v45  ;;  %v419_v1 = vsel %vm410_vm0, %v417_v63, %v418_v0 }
  0xc4   :  { %v456_v14 = vsel %vm447_vm1, %v454_v11, %v455_v13 }
  0xc5   :  { %379 = vrot.lane.b32.xlu0 %v1847_v49, %s1737_s1  ;;  %377 = vrot.lane.b32.xlu1 %v1849_v25, %s1737_s1  ;;  %v1892_v55 = vadd.f32 %v1579_v38, %v1849_v25  ;;  %v420_v2 = vrot.slane %v1849_v25, 2  ;;  %v457_v12 = vrot.slane %v1849_v25, 3 }
  0xc7   :  { %v422_v4 = vsel %vm410_vm0, %v420_v2, %v421_v3  ;;  %v459_v17 = vsel %vm447_vm1, %v457_v12, %v458_v16 }
  0xc9   :  { %260 = vrot.lane.b32.xlu0 %v1859_v46, %s1738_s9  ;;  %258 = vrot.lane.b32.xlu1 %v1862_v47, %s1738_s9 }
  0xcd   :  { %264 = vrot.lane.b32.xlu0 %v1869_v50, %s1738_s9  ;;  %262 = vrot.lane.b32.xlu1 %v1872_v51, %s1738_s9 }
  0xd1   :  { %268 = vrot.lane.b32.xlu0 %v1879_v52, %s1738_s9  ;;  %266 = vrot.lane.b32.xlu1 %v1882_v53, %s1738_s9 }
  0xd5   :  { %272 = vrot.lane.b32.xlu0 %v1889_v54, %s1738_s9  ;;  %270 = vrot.lane.b32.xlu1 %v1892_v55, %s1738_s9 }
  0xd9   :  { %284 = vrot.lane.b32.xlu0 %v1859_v46, %s1739_s3  ;;  %282 = vrot.lane.b32.xlu1 %v1862_v47, %s1739_s3 }
  0xdd   :  { %288 = vrot.lane.b32.xlu0 %v1869_v50, %s1739_s3  ;;  %286 = vrot.lane.b32.xlu1 %v1872_v51, %s1739_s3 }
  0xe1   :  { %292 = vrot.lane.b32.xlu0 %v1879_v52, %s1739_s3  ;;  %290 = vrot.lane.b32.xlu1 %v1882_v53, %s1739_s3 }
  0xe5   :  { %296 = vrot.lane.b32.xlu0 %v1889_v54, %s1739_s3  ;;  %294 = vrot.lane.b32.xlu1 %v1892_v55, %s1739_s3 }
  0xe9   :  { %308 = vrot.lane.b32.xlu0 %v1859_v46, %s1737_s1  ;;  %306 = vrot.lane.b32.xlu1 %v1862_v47, %s1737_s1 }
  0xed   :  { %312 = vrot.lane.b32.xlu0 %v1869_v50, %s1737_s1  ;;  %310 = vrot.lane.b32.xlu1 %v1872_v51, %s1737_s1 }
  0xf1   :  { %316 = vrot.lane.b32.xlu0 %v1879_v52, %s1737_s1  ;;  %314 = vrot.lane.b32.xlu1 %v1882_v53, %s1737_s1 }
  0xf5   :  { %320 = vrot.lane.b32.xlu0 %v1889_v54, %s1737_s1  ;;  %318 = vrot.lane.b32.xlu1 %v1892_v55, %s1737_s1 }
  0xf9   :  { %425 = vrot.lane.b32.xlu0 %v412_v56, %s1738_s9  ;;  %423 = vrot.lane.b32.xlu1 %v413_v58, %s1738_s9 }
  0xfd   :  { %429 = vrot.lane.b32.xlu0 %v415_v60, %s1738_s9  ;;  %427 = vrot.lane.b32.xlu1 %v416_v61, %s1738_s9 }
 0x101   :  { %433 = vrot.lane.b32.xlu0 %v418_v0, %s1738_s9  ;;  %431 = vrot.lane.b32.xlu1 %v419_v1, %s1738_s9 }
 0x105   :  { %437 = vrot.lane.b32.xlu0 %v421_v3, %s1738_s9  ;;  %435 = vrot.lane.b32.xlu1 %v422_v4, %s1738_s9 }
 0x109   :  { %462 = vrot.lane.b32.xlu0 %v449_v5, %s1739_s3  ;;  %460 = vrot.lane.b32.xlu1 %v450_v7, %s1739_s3 }
 0x10d   :  { %466 = vrot.lane.b32.xlu0 %v452_v9, %s1739_s3  ;;  %464 = vrot.lane.b32.xlu1 %v453_v10, %s1739_s3 }
 0x111   :  { %470 = vrot.lane.b32.xlu0 %v455_v13, %s1739_s3  ;;  %468 = vrot.lane.b32.xlu1 %v456_v14, %s1739_s3 }
 0x115   :  { %474 = vrot.lane.b32.xlu0 %v458_v16, %s1739_s3  ;;  %472 = vrot.lane.b32.xlu1 %v459_v17, %s1739_s3 }
 0x127   :  { %v1970_v20 = vpop.permute.xlu1 %365 }
 0x12b   :  { %v1972_v21 = vpop.permute.xlu0 %367 }
 0x12f   :  { %v1974_v22 = vpop.permute.xlu1 %369  ;;  %v1976_v27 = vpop.permute.xlu0 %371 }
 0x133   :  { %v1978_v28 = vpop.permute.xlu1 %373  ;;  %v1980_v29 = vpop.permute.xlu0 %375 }
 0x137   :  { %v1982_v31 = vpop.permute.xlu1 %377  ;;  %v1984_v24 = vpop.permute.xlu0 %379 }
 0x13b   :  { %v259_v32 = vpop.permute.xlu1 %258  ;;  %v261_v18 = vpop.permute.xlu0 %260 }
 0x13c   :  { %v331_v56 = vsel %vm330_vm3, %v1862_v47, %v259_v32  ;;  %v332_v57 = vsel %vm330_vm3, %v1859_v46, %v261_v18 }
 0x13f   :  { %v263_v19 = vpop.permute.xlu1 %262  ;;  %v265_v30 = vpop.permute.xlu0 %264 }
 0x140   :  { %v333_v3 = vsel %vm330_vm3, %v1872_v51, %v263_v19  ;;  %v334_v4 = vsel %vm330_vm3, %v1869_v50, %v265_v30 }
 0x143   :  { %v267_v36 = vpop.permute.xlu1 %266  ;;  %v269_v37 = vpop.permute.xlu0 %268 }
 0x144   :  { %v335_v14 = vsel %vm330_vm3, %v1882_v53, %v267_v36  ;;  %v336_v12 = vsel %vm330_vm3, %v1879_v52, %v269_v37 }
 0x147   :  { %v271_v40 = vpop.permute.xlu1 %270  ;;  %v273_v41 = vpop.permute.xlu0 %272 }
 0x148   :  { %v337_v36 = vsel %vm330_vm3, %v1892_v55, %v271_v40  ;;  %v338_v37 = vsel %vm330_vm3, %v1889_v54, %v273_v41 }
 0x14b   :  { %v283_v42 = vpop.permute.xlu1 %282  ;;  %v285_v23 = vpop.permute.xlu0 %284 }
 0x14c   :  { %v340_v58 = vsel %vm339_vm2, %v331_v56, %v283_v42  ;;  %v341_v59 = vsel %vm339_vm2, %v332_v57, %v285_v23 }
 0x14f   :  { %v287_v39 = vpop.permute.xlu1 %286  ;;  %v289_v44 = vpop.permute.xlu0 %288 }
 0x150   :  { %v342_v5 = vsel %vm339_vm2, %v333_v3, %v287_v39  ;;  %v343_v6 = vsel %vm339_vm2, %v334_v4, %v289_v44 }
 0x153   :  { %v291_v33 = vpop.permute.xlu1 %290  ;;  %v293_v45 = vpop.permute.xlu0 %292 }
 0x154   :  { %v344_v16 = vsel %vm339_vm2, %v335_v14, %v291_v33  ;;  %v345_v17 = vsel %vm339_vm2, %v336_v12, %v293_v45 }
 0x157   :  { %v295_v48 = vpop.permute.xlu1 %294  ;;  %v297_v38 = vpop.permute.xlu0 %296 }
 0x158   :  { %v346_v23 = vsel %vm339_vm2, %v337_v36, %v295_v48  ;;  %v347_v39 = vsel %vm339_vm2, %v338_v37, %v297_v38 }
 0x15b   :  { %v307_v60 = vpop.permute.xlu1 %306  ;;  %v309_v61 = vpop.permute.xlu0 %308 }
 0x15c   :  { %v1993_v63 = vsel %vm348_vm4, %v340_v58, %v307_v60  ;;  %v1996_v0 = vsel %vm348_vm4, %v341_v59, %v309_v61  ;;  %v391_v61 = vrot.slane %v1814_v15, 1 }
 0x15d   :  { %v516_v1 = vrot.slane %v1993_v63, 2  ;;  %v744_v47 = vrot.slane %v1993_v63, 6  ;;  %v517_v2 = vrot.slane %v1996_v0, 2  ;;  %v745_v46 = vrot.slane %v1996_v0, 6 }
 0x15f   :  { %v311_v7 = vpop.permute.xlu1 %310  ;;  %v313_v8 = vpop.permute.xlu0 %312  ;;  %v518_v9 = vsel %vm410_vm0, %v516_v1, %v517_v2  ;;  %v2014_v10 = vsel %vm743_vm5, %v744_v47, %v745_v46  ;;  %v390_v1 = vrot.slane %v1809_v62, 1 }
 0x160   :  { %v2017_v51 = vsel %vm348_vm4, %v342_v5, %v311_v7  ;;  %v2020_v50 = vsel %vm348_vm4, %v343_v6, %v313_v8  ;;  %v393_v5 = vrot.slane %v1826_v35, 1  ;;  %v485_v7 = vsel %vm330_vm3, %v1972_v21, %v391_v61 }
 0x161   :  { %v747_v11 = vrot.slane %v2017_v51, 6  ;;  %v748_v13 = vrot.slane %v2020_v50, 6  ;;  %v392_v4 = vsel %vm389_vm6, %v390_v1, %v391_v61  ;;  %v394_v8 = vrot.slane %v1824_v34, 1 }
 0x162   :  { %v484_v6 = vsel %vm330_vm3, %v1970_v20, %v392_v4  ;;  %v396_v21 = vrot.slane %v1838_v43, 1  ;;  %v399_v61 = vrot.slane %v1849_v25, 1 }
 0x163   :  { %v315_v32 = vpop.permute.xlu1 %314  ;;  %v317_v18 = vpop.permute.xlu0 %316  ;;  %v2033_v19 = vsel %vm743_vm5, %v747_v11, %v748_v13  ;;  %v395_v20 = vsel %vm389_vm6, %v393_v5, %v394_v8 }
 0x164   :  { %v2036_v30 = vsel %vm348_vm4, %v344_v16, %v315_v32  ;;  %v2039_v42 = vsel %vm348_vm4, %v345_v17, %v317_v18  ;;  %v519_v17 = vrot.slane %v2017_v51, 2  ;;  %v520_v32 = vrot.slane %v2020_v50, 2 }
 0x165   :  { %v750_v53 = vrot.slane %v2036_v30, 6  ;;  %v751_v52 = vrot.slane %v2039_v42, 6  ;;  %v397_v50 = vrot.slane %v1836_v26, 1 }
 0x167   :  { %v319_v44 = vpop.permute.xlu1 %318  ;;  %v321_v33 = vpop.permute.xlu0 %320  ;;  %v2052_v45 = vsel %vm743_vm5, %v750_v53, %v751_v52 }
 0x168   :  { %v2055_v56 = vsel %vm348_vm4, %v346_v23, %v319_v44  ;;  %v2058_v57 = vsel %vm348_vm4, %v347_v39, %v321_v33  ;;  %v486_v23 = vsel %vm330_vm3, %v1974_v22, %v395_v20  ;;  %v487_v39 = vsel %vm330_vm3, %v1976_v27, %v394_v8 }
 0x169   :  { %v753_v55 = vrot.slane %v2055_v56, 6  ;;  %v754_v54 = vrot.slane %v2058_v57, 6  ;;  %v522_v44 = vrot.slane %v2036_v30, 2  ;;  %v523_v33 = vrot.slane %v2039_v42, 2 }
 0x16a   :  { %v521_v22 = vsel %vm410_vm0, %v519_v17, %v520_v32  ;;  %v398_v27 = vsel %vm389_vm6, %v396_v21, %v397_v50  ;;  %v525_v5 = vrot.slane %v2055_v56, 2 }
 0x16b   :  { %v424_v40 = vpop.permute.xlu1 %423  ;;  %v426_v41 = vpop.permute.xlu0 %425  ;;  %v2065_v48 = vsel %vm743_vm5, %v753_v55, %v754_v54  ;;  %v488_v42 = vsel %vm330_vm3, %v1978_v28, %v398_v27 }
 0x16c   :  { %v492_v13 = vsel %vm339_vm2, %v484_v6, %v424_v40  ;;  %v493_v14 = vsel %vm339_vm2, %v485_v7, %v426_v41 }
 0x16f   :  { %v428_v38 = vpop.permute.xlu1 %427  ;;  %v430_v58 = vpop.permute.xlu0 %429 }
 0x170   :  { %v494_v54 = vsel %vm339_vm2, %v486_v23, %v428_v38  ;;  %v489_v38 = vsel %vm330_vm3, %v1980_v29, %v397_v50 }
 0x173   :  { %v432_v59 = vpop.permute.xlu1 %431  ;;  %v434_v60 = vpop.permute.xlu0 %433 }
 0x174   :  { %v496_v6 = vsel %vm339_vm2, %v488_v42, %v432_v59  ;;  %v497_v7 = vsel %vm339_vm2, %v489_v38, %v434_v60 }
 0x177   :  { %v436_v46 = vpop.permute.xlu1 %435  ;;  %v438_v3 = vpop.permute.xlu0 %437 }
 0x17b   :  { %v461_v12 = vpop.permute.xlu1 %460  ;;  %v463_v16 = vpop.permute.xlu0 %462 }
 0x17c   :  { %v500_v18 = vsel %vm348_vm4, %v492_v13, %v461_v12  ;;  %v501_v52 = vsel %vm348_vm4, %v493_v14, %v463_v16  ;;  %v524_v13 = vsel %vm410_vm0, %v522_v44, %v523_v33  ;;  %v526_v12 = vrot.slane %v2058_v57, 2 }
 0x17d   :  { %v2084_v36 = vadd.f32 %v518_v9, %v500_v18  ;;  %v537_v37 = vadd.f32 %v517_v2, %v501_v52  ;;  %v495_v9 = vsel %vm339_vm2, %v487_v39, %v430_v58  ;;  %v400_v58 = vrot.slane %v1847_v49, 1 }
 0x17f   :  { %v465_v40 = vpop.permute.xlu1 %464  ;;  %v467_v41 = vpop.permute.xlu0 %466  ;;  %1597 = vtanh.f32 %v537_v37  ;;  %v401_v29 = vsel %vm389_vm6, %v399_v61, %v400_v58  ;;  %v491_v60 = vsel %vm330_vm3, %v1984_v24, %v400_v58  ;;  %v527_v37 = vsel %vm410_vm0, %v525_v5, %v526_v12 }
 0x180   :  { %v502_v0 = vsel %vm348_vm4, %v494_v54, %v465_v40  ;;  %v503_v2 = vsel %vm348_vm4, %v495_v9, %v467_v41  ;;  %v490_v59 = vsel %vm330_vm3, %v1982_v31, %v401_v29  ;;  %v499_v52 = vsel %vm339_vm2, %v491_v60, %v438_v3  ;;  %v2127_v31 = vld [vmem:[%s2785_s2] ss:$0 sm:$0xff] }
 0x181   :  { %v538_v1 = vadd.f32 %v521_v22, %v502_v0  ;;  %v539_v4 = vadd.f32 %v520_v32, %v503_v2  ;;  %v498_v18 = vsel %vm339_vm2, %v490_v59, %v436_v46 }
 0x183   :  { %v469_v8 = vpop.permute.xlu1 %468  ;;  %v471_v14 = vpop.permute.xlu0 %470  ;;  %1599 = vtanh.f32 %v539_v4 }
 0x184   :  { %v504_v28 = vsel %vm348_vm4, %v496_v6, %v469_v8  ;;  %v505_v16 = vsel %vm348_vm4, %v497_v7, %v471_v14 }
 0x185   :  { %v540_v17 = vadd.f32 %v524_v13, %v504_v28  ;;  %v541_v32 = vadd.f32 %v523_v33, %v505_v16 }
 0x187   :  { %v473_v57 = vpop.permute.xlu1 %472  ;;  %v475_v20 = vpop.permute.xlu0 %474  ;;  %1601 = vtanh.f32 %v541_v32 }
 0x188   :  { %v506_v21 = vsel %vm348_vm4, %v498_v18, %v473_v57  ;;  %v507_v23 = vsel %vm348_vm4, %v499_v52, %v475_v20 }
 0x189   :  { %v542_v39 = vadd.f32 %v527_v37, %v506_v21  ;;  %v543_v50 = vadd.f32 %v526_v12, %v507_v23 }
 0x18b   :  { %1603 = vtanh.f32 %v543_v50 }
 0x18c   :  { %v1598_v24 = vpop.eup %1597  ;;  %1605 = vtanh.f32 %v538_v1 }
 0x18d   :  { %v559_v46 = vmul.f32 %v1598_v24, %v2127_v31  ;;  %1607 = vtanh.f32 %v540_v17 }
 0x18e   :  { %1609 = vtanh.f32 %v542_v39 }
 0x18f   :  { %601 = vrot.lane.b32.xlu1 %v559_v46, %s1737_s1  ;;  %v570_v2 = vsel %vm569_vm7, %v559_v46, 0.0  ;;  %1611 = vtanh.f32 %v2084_v36 }
 0x190   :  { %v1600_v3 = vpop.eup %1599 }
 0x191   :  { %v561_v44 = vmul.f32 %v1600_v3, %v2127_v31 }
 0x193   :  { %649 = vrot.lane.b32.xlu1 %v559_v46, %s1739_s3  ;;  %605 = vrot.lane.b32.xlu0 %v561_v44, %s1737_s1  ;;  %v576_v41 = vsel %vm569_vm7, %v561_v44, 0.0 }
 0x194   :  { %v1602_v33 = vpop.eup %1601 }
 0x195   :  { %v563_v54 = vmul.f32 %v1602_v33, %v2127_v31 }
 0x197   :  { %609 = vrot.lane.b32.xlu0 %v563_v54, %s1737_s1  ;;  %v582_v0 = vsel %vm569_vm7, %v563_v54, 0.0 }
 0x198   :  { %v1604_v9 = vpop.eup %1603 }
 0x199   :  { %v2137_v40 = vmul.f32 %v1604_v9, %v2127_v31  ;;  %v1606_v27 = vpop.eup %1605 }
 0x19a   :  { %v560_v61 = vmul.f32 %v1606_v27, %v2127_v31  ;;  %v1608_v4 = vpop.eup %1607 }
 0x19b   :  { %613 = vrot.lane.b32.xlu0 %v2137_v40, %s1737_s1  ;;  %v588_v22 = vsel %vm569_vm7, %v2137_v40, 0.0  ;;  %v562_v42 = vmul.f32 %v1608_v4, %v2127_v31  ;;  %v1610_v1 = vpop.eup %1609 }
 0x19c   :  { %v564_v38 = vmul.f32 %v1610_v1, %v2127_v31  ;;  %v1612_v58 = vpop.eup %1611  ;;  %v573_v36 = vsel %vm330_vm3, %v560_v61, 0.0 }
 0x19d   :  { %v558_v5 = vmul.f32 %v1612_v58, %v2127_v31  ;;  %v579_v6 = vsel %vm330_vm3, %v562_v42, 0.0 }
 0x19e   :  { %v585_v7 = vsel %vm330_vm3, %v564_v38, 0.0 }
 0x19f   :  { %653 = vrot.lane.b32.xlu0 %v561_v44, %s1739_s3  ;;  %v566_v8 = vsel %vm330_vm3, %v558_v5, 0.0 }
 0x1a3   :  { %657 = vrot.lane.b32.xlu0 %v563_v54, %s1739_s3 }
 0x1a7   :  { %661 = vrot.lane.b32.xlu0 %v2137_v40, %s1739_s3 }
 0x1b7   :  { %577 = vadd.xlane.f32.xlu1 %v576_v41 }
 0x1bb   :  { %583 = vadd.xlane.f32.xlu1 %v582_v0 }
 0x1bf   :  { %589 = vadd.xlane.f32.xlu1 %v588_v22 }
 0x1c6   :  { %571 = vadd.xlane.f32.xlu0 %v570_v2 }
 0x1d0   :  { %603 = vrot.lane.b32.xlu1 %v560_v61, %s1737_s1 }
 0x1d4   :  { %607 = vrot.lane.b32.xlu1 %v562_v42, %s1737_s1 }
 0x1d8   :  { %611 = vrot.lane.b32.xlu1 %v564_v38, %s1737_s1 }
 0x1dc   :  { %599 = vrot.lane.b32.xlu0 %v558_v5, %s1737_s1  ;;  %651 = vrot.lane.b32.xlu1 %v560_v61, %s1739_s3 }
 0x1e0   :  { %647 = vrot.lane.b32.xlu0 %v558_v5, %s1739_s3  ;;  %655 = vrot.lane.b32.xlu1 %v562_v42, %s1739_s3 }
 0x1e4   :  { %659 = vrot.lane.b32.xlu1 %v564_v38, %s1739_s3 }
 0x1ff   :  { %574 = vadd.xlane.f32.xlu0 %v573_v36 }
 0x201   :  { %v602_v14 = vpop.permute.xlu1 %601 }
 0x202   :  { %v626_v17 = vsel %vm569_vm7, %v602_v14, 0.0 }
 0x203   :  { %580 = vadd.xlane.f32.xlu0 %v579_v6 }
 0x205   :  { %v606_v13 = vpop.permute.xlu0 %605  ;;  %v650_v28 = vpop.permute.xlu1 %649 }
 0x206   :  { %v674_v60 = vsel %vm569_vm7, %v650_v28, 0.0  ;;  %v632_v52 = vsel %vm569_vm7, %v606_v13, 0.0 }
 0x207   :  { %586 = vadd.xlane.f32.xlu0 %v585_v7 }
 0x208   :  { %567 = vadd.xlane.f32.xlu1 %v566_v8 }
 0x209   :  { %v610_v12 = vpop.permute.xlu0 %609 }
 0x20a   :  { %v638_v21 = vsel %vm569_vm7, %v610_v12, 0.0 }
 0x20d   :  { %v614_v16 = vpop.permute.xlu0 %613 }
 0x20e   :  { %v644_v39 = vsel %vm569_vm7, %v614_v16, 0.0 }
 0x211   :  { %v654_v59 = vpop.permute.xlu0 %653 }
 0x212   :  { %v680_v3 = vsel %vm569_vm7, %v654_v59, 0.0 }
 0x215   :  { %v658_v57 = vpop.permute.xlu0 %657 }
 0x216   :  { %v686_v9 = vsel %vm569_vm7, %v658_v57, 0.0 }
 0x219   :  { %697 = vrot.lane.b32.xlu1 %v559_v46, %s1738_s9  ;;  %v662_v50 = vpop.permute.xlu0 %661 }
 0x21a   :  { %v692_v2 = vsel %vm569_vm7, %v662_v50, 0.0 }
 0x21d   :  { %695 = vrot.lane.b32.xlu0 %v558_v5, %s1738_s9  ;;  %699 = vrot.lane.b32.xlu1 %v560_v61, %s1738_s9 }
 0x221   :  { %701 = vrot.lane.b32.xlu0 %v561_v44, %s1738_s9  ;;  %703 = vrot.lane.b32.xlu1 %v562_v42, %s1738_s9 }
 0x225   :  { %705 = vrot.lane.b32.xlu0 %v563_v54, %s1738_s9  ;;  %707 = vrot.lane.b32.xlu1 %v564_v38, %s1738_s9 }
 0x240   :  { %v2174_v29 = vpop.xlane.xlu1 %577 }
 0x244   :  { %v2177_v32 = vpop.xlane.xlu1 %583  ;;  %627 = vadd.xlane.f32.xlu0 %v626_v17 }
 0x248   :  { %675 = vadd.xlane.f32.xlu0 %v674_v60  ;;  %v2180_v18 = vpop.xlane.xlu1 %589 }
 0x249   :  { %633 = vadd.xlane.f32.xlu1 %v632_v52 }
 0x24c   :  { %v604_v20 = vpop.permute.xlu1 %603 }
 0x24d   :  { %639 = vadd.xlane.f32.xlu1 %v638_v21  ;;  %v629_v37 = vsel %vm330_vm3, %v604_v20, 0.0 }
 0x24e   :  { %630 = vadd.xlane.f32.xlu0 %v629_v37 }
 0x24f   :  { %v2188_v44 = vpop.xlane.xlu0 %571 }
 0x250   :  { %v608_v23 = vpop.permute.xlu1 %607 }
 0x251   :  { %645 = vadd.xlane.f32.xlu1 %v644_v39  ;;  %v635_v24 = vsel %vm330_vm3, %v608_v23, 0.0 }
 0x252   :  { %636 = vadd.xlane.f32.xlu0 %v635_v24 }
 0x253   :  { %v600_v0 = vpop.permute.xlu0 %599 }
 0x254   :  { %v612_v46 = vpop.permute.xlu1 %611  ;;  %v623_v4 = vsel %vm330_vm3, %v600_v0, 0.0 }
 0x255   :  { %681 = vadd.xlane.f32.xlu1 %v680_v3  ;;  %v641_v33 = vsel %vm330_vm3, %v612_v46, 0.0 }
 0x256   :  { %642 = vadd.xlane.f32.xlu0 %v641_v33 }
 0x257   :  { %v648_v42 = vpop.permute.xlu0 %647 }
 0x258   :  { %v652_v54 = vpop.permute.xlu1 %651  ;;  %v671_v38 = vsel %vm330_vm3, %v648_v42, 0.0 }
 0x259   :  { %687 = vadd.xlane.f32.xlu1 %v686_v9  ;;  %v677_v41 = vsel %vm330_vm3, %v652_v54, 0.0 }
 0x25a   :  { %678 = vadd.xlane.f32.xlu0 %v677_v41 }
 0x25c   :  { %v656_v22 = vpop.permute.xlu1 %655 }
 0x25d   :  { %693 = vadd.xlane.f32.xlu1 %v692_v2  ;;  %v683_v27 = vsel %vm330_vm3, %v656_v22, 0.0 }
 0x25e   :  { %684 = vadd.xlane.f32.xlu0 %v683_v27 }
 0x260   :  { %v660_v61 = vpop.permute.xlu1 %659 }
 0x261   :  { %624 = vadd.xlane.f32.xlu1 %v623_v4  ;;  %v689_v1 = vsel %vm330_vm3, %v660_v61, 0.0 }
 0x262   :  { %690 = vadd.xlane.f32.xlu0 %v689_v1 }
 0x265   :  { %672 = vadd.xlane.f32.xlu1 %v671_v38 }
 0x276   :  { %758 = vrot.lane.b32.xlu1 %v2014_v10, %s1738_s9 }
 0x278   :  { %756 = vrot.lane.b32.xlu0 %v744_v47, %s1738_s9 }
 0x27a   :  { %762 = vrot.lane.b32.xlu1 %v2033_v19, %s1738_s9 }
 0x27c   :  { %760 = vrot.lane.b32.xlu0 %v747_v11, %s1738_s9 }
 0x27e   :  { %766 = vrot.lane.b32.xlu1 %v2052_v45, %s1738_s9 }
 0x280   :  { %764 = vrot.lane.b32.xlu0 %v750_v53, %s1738_s9 }
 0x282   :  { %770 = vrot.lane.b32.xlu1 %v2065_v48, %s1738_s9 }
 0x284   :  { %768 = vrot.lane.b32.xlu0 %v753_v55, %s1738_s9 }
 0x286   :  { %709 = vrot.lane.b32.xlu1 %v2137_v40, %s1738_s9 }
 0x288   :  { %796 = vrot.lane.b32.xlu0 %v2127_v31, %s1738_s9  ;;  %v2222_v63 = vpop.xlane.xlu0 %574 }
 0x28c   :  { %v2226_v10 = vpop.xlane.xlu0 %580 }
 0x290   :  { %v2228_v11 = vpop.xlane.xlu0 %586 }
 0x291   :  { %v2224_v47 = vpop.xlane.xlu1 %567 }
 0x294   :  { %v696_v30 = vpop.permute.xlu0 %695 }
 0x295   :  { %v698_v51 = vpop.permute.xlu1 %697  ;;  %v719_v53 = vsel %vm330_vm3, %v696_v30, 0.0 }
 0x296   :  { %v722_v55 = vsel %vm569_vm7, %v698_v51, 0.0 }
 0x298   :  { %v702_v56 = vpop.permute.xlu0 %701 }
 0x299   :  { %v700_v19 = vpop.permute.xlu1 %699  ;;  %v728_v40 = vsel %vm569_vm7, %v702_v56, 0.0 }
 0x29a   :  { %v725_v48 = vsel %vm330_vm3, %v700_v19, 0.0 }
 0x29c   :  { %v706_v5 = vpop.permute.xlu0 %705 }
 0x29d   :  { %v704_v45 = vpop.permute.xlu1 %703  ;;  %v734_v6 = vsel %vm569_vm7, %v706_v5, 0.0 }
 0x29e   :  { %v731_v31 = vsel %vm330_vm3, %v704_v45, 0.0 }
 0x2a1   :  { %v708_v58 = vpop.permute.xlu1 %707 }
 0x2a2   :  { %v737_v36 = vsel %vm330_vm3, %v708_v58, 0.0 }
 0x2a7   :  { %720 = vadd.xlane.f32.xlu0 %v719_v53 }
 0x2aa   :  { %723 = vadd.xlane.f32.xlu1 %v722_v55 }
 0x2ab   :  { %726 = vadd.xlane.f32.xlu0 %v725_v48 }
 0x2ae   :  { %732 = vadd.xlane.f32.xlu1 %v731_v31 }
 0x2af   :  { %729 = vadd.xlane.f32.xlu0 %v728_v40 }
 0x2b2   :  { %738 = vadd.xlane.f32.xlu1 %v737_v36 }
 0x2b3   :  { %735 = vadd.xlane.f32.xlu0 %v734_v6 }
 0x2cd   :  { %v2237_v7 = vpop.xlane.xlu0 %627 }
 0x2d1   :  { %v2241_v13 = vpop.xlane.xlu0 %675 }
 0x2d2   :  { %v2239_v8 = vpop.xlane.xlu1 %633 }
 0x2d6   :  { %v2243_v14 = vpop.xlane.xlu1 %639 }
 0x2d7   :  { %v2245_v12 = vpop.xlane.xlu0 %630 }
 0x2da   :  { %v2247_v28 = vpop.xlane.xlu1 %645 }
 0x2db   :  { %v2249_v16 = vpop.xlane.xlu0 %636 }
 0x2de   :  { %v2251_v17 = vpop.xlane.xlu1 %681 }
 0x2df   :  { %v2253_v59 = vpop.xlane.xlu0 %642 }
 0x2e2   :  { %v2255_v60 = vpop.xlane.xlu1 %687 }
 0x2e3   :  { %v2257_v52 = vpop.xlane.xlu0 %678 }
 0x2e6   :  { %v2259_v57 = vpop.xlane.xlu1 %693 }
 0x2e7   :  { %v2261_v20 = vpop.xlane.xlu0 %684 }
 0x2ea   :  { %v2263_v21 = vpop.xlane.xlu1 %624 }
 0x2eb   :  { %v2265_v37 = vpop.xlane.xlu0 %690 }
 0x2ee   :  { %v2267_v23 = vpop.xlane.xlu1 %672 }
 0x2ef   :  { %v757_v39 = vpop.permute.xlu0 %756 }
 0x2f0   :  { %v780_v50 = vadd.f32 %v757_v39, %v1809_v62 }
 0x2f2   :  { %1613 = vtanh.f32 %v780_v50  ;;  %v759_v24 = vpop.permute.xlu1 %758 }
 0x2f3   :  { %v761_v46 = vpop.permute.xlu0 %760  ;;  %v781_v1 = vadd.f32 %v759_v24, %v1814_v15 }
 0x2f4   :  { %v782_v3 = vadd.f32 %v761_v46, %v1826_v35 }
 0x2f6   :  { %1615 = vtanh.f32 %v782_v3  ;;  %v763_v33 = vpop.permute.xlu1 %762 }
 0x2f7   :  { %v783_v54 = vadd.f32 %v763_v33, %v1824_v34  ;;  %v765_v9 = vpop.permute.xlu0 %764 }
 0x2f9   :  { %1617 = vtanh.f32 %v783_v54 }
 0x2fa   :  { %v767_v41 = vpop.permute.xlu1 %766 }
 0x2fb   :  { %v785_v0 = vadd.f32 %v767_v41, %v1836_v26  ;;  %v769_v22 = vpop.permute.xlu0 %768 }
 0x2fc   :  { %v786_v53 = vadd.f32 %v769_v22, %v1849_v25 }
 0x2fd   :  { %1619 = vtanh.f32 %v785_v0 }
 0x2fe   :  { %v771_v2 = vpop.permute.xlu1 %770 }
 0x2ff   :  { %v1614_v27 = vpop.eup %1613  ;;  %v787_v62 = vadd.f32 %v771_v2, %v1847_v49  ;;  %v797_v61 = vpop.permute.xlu0 %796  ;;  %v784_v49 = vadd.f32 %v765_v9, %v1838_v43 }
 0x300   :  { %v799_v4 = vmul.f32 %v1614_v27, %v797_v61 }
 0x301   :  { %1621 = vtanh.f32 %v787_v62 }
 0x302   :  { %v710_v42 = vpop.permute.xlu1 %709  ;;  %815 = vrot.lane.b32.xlu1 %v799_v4, %s1737_s1  ;;  %1623 = vtanh.f32 %v781_v1 }
 0x303   :  { %v1616_v35 = vpop.eup %1615  ;;  %v740_v34 = vsel %vm569_vm7, %v710_v42, 0.0  ;;  %1625 = vtanh.f32 %v784_v49 }
 0x304   :  { %741 = vadd.xlane.f32.xlu0 %v740_v34  ;;  %v801_v38 = vmul.f32 %v1616_v35, %v797_v61  ;;  %1627 = vtanh.f32 %v786_v53 }
 0x306   :  { %v1618_v26 = vpop.eup %1617  ;;  %819 = vrot.lane.b32.xlu1 %v801_v38, %s1737_s1 }
 0x307   :  { %v802_v51 = vmul.f32 %v1618_v26, %v797_v61  ;;  %v867_v26 = vmax.f32 %v2174_v29, %v2239_v8 }
 0x309   :  { %v875_v49 = vmax.f32 %v867_v26, %v2251_v17 }
 0x30a   :  { %v1620_v19 = vpop.eup %1619  ;;  %821 = vrot.lane.b32.xlu1 %v802_v51, %s1737_s1  ;;  %v866_v51 = vmax.f32 %v2222_v63, %v2245_v12 }
 0x30b   :  { %v804_v30 = vmul.f32 %v1620_v19, %v797_v61 }
 0x30e   :  { %v1622_v45 = vpop.eup %1621  ;;  %825 = vrot.lane.b32.xlu1 %v804_v30, %s1737_s1  ;;  %v874_v30 = vmax.f32 %v866_v51, %v2257_v52 }
 0x30f   :  { %v806_v15 = vmul.f32 %v1622_v45, %v797_v61  ;;  %v1624_v56 = vpop.eup %1623 }
 0x310   :  { %v800_v55 = vmul.f32 %v1624_v56, %v797_v61  ;;  %v1626_v48 = vpop.eup %1625 }
 0x311   :  { %v803_v43 = vmul.f32 %v1626_v48, %v797_v61  ;;  %v1628_v31 = vpop.eup %1627 }
 0x312   :  { %829 = vrot.lane.b32.xlu1 %v806_v15, %s1737_s1  ;;  %v805_v40 = vmul.f32 %v1628_v31, %v797_v61 }
 0x31a   :  { %817 = vrot.lane.b32.xlu0 %v800_v55, %s1737_s1 }
 0x31e   :  { %823 = vrot.lane.b32.xlu0 %v803_v43, %s1737_s1  ;;  %v869_v43 = vmax.f32 %v2177_v32, %v2243_v14 }
 0x322   :  { %827 = vrot.lane.b32.xlu0 %v805_v40, %s1737_s1  ;;  %v871_v40 = vmax.f32 %v2180_v18, %v2247_v28 }
 0x330   :  { %v2293_v39 = vpop.xlane.xlu0 %720 }
 0x333   :  { %v2286_v25 = vpop.xlane.xlu1 %723 }
 0x334   :  { %v2296_v3 = vpop.xlane.xlu0 %726 }
 0x335   :  { %v882_v56 = vmax.f32 %v874_v30, %v2296_v3 }
 0x337   :  { %v2288_v58 = vpop.xlane.xlu1 %732 }
 0x338   :  { %v730_v41 = vpop.xlane.xlu0 %729 }
 0x339   :  { %v883_v53 = vmax.f32 %v875_v49, %v730_v41 }
 0x33b   :  { %v2290_v5 = vpop.xlane.xlu1 %738 }
 0x33c   :  { %v2301_v2 = vpop.xlane.xlu0 %735 }
 0x374   :  { %v816_v36 = vpop.permute.xlu1 %815 }
 0x375   :  { %v840_v6 = vsel %vm839_vm8, %v816_v36, 0.0 }
 0x376   :  { %841 = vadd.xlane.f32.xlu0 %v840_v6 }
 0x378   :  { %v820_v50 = vpop.permute.xlu1 %819 }
 0x379   :  { %v846_v24 = vsel %vm839_vm8, %v820_v50, 0.0 }
 0x37a   :  { %847 = vadd.xlane.f32.xlu0 %v846_v24 }
 0x37c   :  { %v822_v46 = vpop.permute.xlu1 %821 }
 0x37d   :  { %v849_v33 = vsel %vm330_vm3, %v822_v46, 0.0  ;;  %v877_v46 = vmax.f32 %v869_v43, %v2255_v60 }
 0x37e   :  { %850 = vadd.xlane.f32.xlu0 %v849_v33  ;;  %v879_v33 = vmax.f32 %v871_v40, %v2259_v57 }
 0x380   :  { %v826_v54 = vpop.permute.xlu1 %825 }
 0x381   :  { %v855_v9 = vsel %vm330_vm3, %v826_v54, 0.0 }
 0x382   :  { %856 = vadd.xlane.f32.xlu0 %v855_v9 }
 0x384   :  { %v830_v0 = vpop.permute.xlu1 %829 }
 0x385   :  { %v861_v22 = vsel %vm330_vm3, %v830_v0, 0.0 }
 0x386   :  { %862 = vadd.xlane.f32.xlu0 %v861_v22 }
 0x38d   :  { %v2303_v27 = vpop.xlane.xlu0 %741 }
 0x391   :  { %v818_v62 = vpop.permute.xlu0 %817 }
 0x392   :  { %v843_v61 = vsel %vm330_vm3, %v818_v62, 0.0  ;;  %v885_v62 = vmax.f32 %v877_v46, %v2301_v2 }
 0x393   :  { %844 = vadd.xlane.f32.xlu1 %v843_v61  ;;  %v887_v61 = vmax.f32 %v879_v33, %v2303_v27 }
 0x395   :  { %v824_v4 = vpop.permute.xlu0 %823 }
 0x396   :  { %v852_v42 = vsel %vm839_vm8, %v824_v4, 0.0 }
 0x397   :  { %853 = vadd.xlane.f32.xlu1 %v852_v42 }
 0x399   :  { %v828_v35 = vpop.permute.xlu0 %827 }
 0x39a   :  { %v858_v34 = vsel %vm839_vm8, %v828_v35, 0.0 }
 0x39b   :  { %859 = vadd.xlane.f32.xlu1 %v858_v34 }
 0x3ff   :  { %v2308_v1 = vpop.xlane.xlu0 %841 }
 0x403   :  { %v848_v38 = vpop.xlane.xlu0 %847 }
 0x404   :  { %v900_v45 = vrot.slane %v848_v38, 4 }
 0x407   :  { %v851_v19 = vpop.xlane.xlu0 %850 }
 0x408   :  { %v901_v15 = vrot.slane %v851_v19, 4 }
 0x40a   :  { %v902_v55 = vsel %vm896_vm9, %v900_v45, %v901_v15  ;;  %v920_v48 = vmax.f32 %v883_v53, %v901_v15 }
 0x40b   :  { %v2320_v31 = vpop.xlane.xlu0 %856  ;;  %v2324_v36 = vmax.f32 %v882_v56, %v902_v55 }
 0x40c   :  { %v928_v6 = vsub.f32 %v2174_v29, %v920_v48  ;;  %v1016_v50 = vsub.f32 %v2239_v8, %v920_v48  ;;  %v1124_v24 = vsub.f32 %v2251_v17, %v920_v48  ;;  %v1232_v9 = vsub.f32 %v730_v41, %v920_v48 }
 0x40d   :  { %v1348_v29 = vrot.slane %v2324_v36, 4  ;;  %v1349_v8 = vrot.slane %v920_v48, 4  ;;  %v904_v17 = vrot.slane %v2320_v31, 4  ;;  %v1015_v46 = vsub.f32 %v2245_v12, %v2324_v36 }
 0x40e   :  { %v939_v54 = vmul.f32 1.442695, %v928_v6  ;;  %v1027_v0 = vmul.f32 1.442695, %v1016_v50  ;;  %v1135_v4 = vmul.f32 1.442695, %v1124_v24 }
 0x40f   :  { %v2331_v22 = vpop.xlane.xlu0 %862  ;;  %v1243_v35 = vmul.f32 1.442695, %v1232_v9  ;;  %v1367_v34 = vsub.f32 %v848_v38, %v1348_v29  ;;  %v1350_v41 = vsel %vm896_vm9, %v1348_v29, %v1349_v8  ;;  %v2341_v26 = vmax.f32 %v885_v62, %v904_v17 }
 0x410   :  { %1629 = vpow2.f32 %v939_v54  ;;  %v907_v42 = vrot.slane %v2331_v22, 4  ;;  %v1368_v49 = vsub.f32 %v851_v19, %v1350_v41  ;;  %v865_v19 = vmax.f32 %v2188_v44, %v2237_v7 }
 0x411   :  { %1631 = vpow2.f32 %v1027_v0  ;;  %v1377_v30 = vmul.f32 1.442695, %v1367_v34  ;;  %v930_v53 = vsub.f32 %v2177_v32, %v2341_v26  ;;  %v1018_v38 = vsub.f32 %v2243_v14, %v2341_v26 }
 0x412   :  { %v2345_v51 = vmax.f32 %v887_v61, %v907_v42  ;;  %1633 = vpow2.f32 %v1135_v4  ;;  %v1379_v45 = vmul.f32 1.442695, %v1368_v49  ;;  %v873_v43 = vmax.f32 %v865_v19, %v2241_v13 }
 0x413   :  { %1635 = vpow2.f32 %v1243_v35  ;;  %v943_v56 = vmul.f32 1.442695, %v930_v53  ;;  %v1031_v55 = vmul.f32 1.442695, %v1018_v38  ;;  %v1025_v12 = vmul.f32 1.442695, %v1015_v46 }
 0x414   :  { %v932_v15 = vsub.f32 %v2180_v18, %v2345_v51  ;;  %1637 = vpow2.f32 %v1377_v30  ;;  %v1020_v48 = vsub.f32 %v2247_v28, %v2345_v51  ;;  %v881_v6 = vmax.f32 %v873_v43, %v2286_v25 }
 0x415   :  { %1639 = vpow2.f32 %v1379_v45  ;;  %v864_v45 = vmax.f32 %v2224_v47, %v2263_v21  ;;  %v1126_v43 = vsub.f32 %v2255_v60, %v2341_v26 }
 0x416   :  { %1641 = vpow2.f32 %v943_v56  ;;  %v947_v32 = vmul.f32 1.442695, %v932_v15  ;;  %v1035_v14 = vmul.f32 1.442695, %v1020_v48 }
 0x417   :  { %1643 = vpow2.f32 %v1031_v55 }
 0x418   :  { %1645 = vpow2.f32 %v947_v32 }
 0x419   :  { %1647 = vpow2.f32 %v1035_v14 }
 0x41c   :  { %v2358_v40 = vpop.xlane.xlu1 %844 }
 0x41d   :  { %v1630_v18 = vpop.eup %1629  ;;  %v898_v50 = vrot.slane %v2358_v40, 4 }
 0x41e   :  { %974 = vperm.xlu1 %1596, %v1630_v18   ;;  %v2364_v24 = vpop.eup %1631 }
 0x41f   :  { %v2362_v28 = vmax.f32 %v881_v6, %v898_v50  ;;  %v1040_v33 = vadd.f32 %v2364_v24, %v1630_v18  ;;  %v2373_v0 = vpop.eup %1633  ;;  %v870_v18 = vmax.f32 %v2228_v11, %v2253_v59  ;;  %v872_v6 = vmax.f32 %v864_v45, %v2267_v23 }
 0x420   :  { %v2376_v29 = vpop.xlane.xlu1 %853  ;;  %v2378_v4 = vpop.eup %1635 }
 0x421   :  { %v926_v54 = vsub.f32 %v2188_v44, %v2362_v28  ;;  %v1014_v9 = vsub.f32 %v2237_v7, %v2362_v28  ;;  %v1148_v62 = vadd.f32 %v2373_v0, %v1040_v33  ;;  %v2380_v35 = vpop.eup %1637  ;;  %v868_v7 = vmax.f32 %v2226_v10, %v2249_v16 }
 0x422   :  { %v2383_v44 = vpop.eup %1639  ;;  %v1400_v41 = vrot.slane %v2380_v35, 4  ;;  %v903_v15 = vrot.slane %v2376_v29, 4  ;;  %v878_v60 = vmax.f32 %v870_v18, %v2265_v37  ;;  %v1122_v45 = vsub.f32 %v2241_v13, %v2362_v28 }
 0x423   :  { %v935_v61 = vmul.f32 1.442695, %v926_v54  ;;  %v1023_v8 = vmul.f32 1.442695, %v1014_v9  ;;  %v1256_v34 = vadd.f32 %v2378_v4, %v1148_v62  ;;  %v1642_v49 = vpop.eup %1641  ;;  %v1401_v30 = vrot.slane %v2383_v44, 4 }
 0x424   :  { %v2389_v53 = vpop.eup %1643  ;;  %v876_v38 = vmax.f32 %v868_v7, %v2261_v20  ;;  %984 = vperm.xlu1 %1596, %v1642_v49   ;;  %v2403_v19 = vpop.xlane.xlu1 %859  ;;  %v905_v46 = vsel %vm896_vm9, %v903_v15, %v904_v17  ;;  %v897_v54 = vrot.slane %v2308_v1, 4  ;;  %v1234_v17 = vsub.f32 %v2301_v2, %v2341_v26 }
 0x425   :  { %1649 = vpow2.f32 %v935_v61  ;;  %v2396_v56 = vsel %vm896_vm9, %v1400_v41, %v1401_v30  ;;  %v2398_v55 = vadd.f32 %v1401_v30, %v1256_v34  ;;  %v2401_v48 = vadd.f32 %v2389_v53, %v1642_v49  ;;  %v1646_v14 = vpop.eup %1645 }
 0x426   :  { %1651 = vpow2.f32 %v1023_v8  ;;  %v884_v32 = vmax.f32 %v876_v38, %v2288_v58  ;;  %v2414_v33 = vpop.eup %1647  ;;  %v906_v62 = vrot.slane %v2403_v19, 4  ;;  %v880_v61 = vmax.f32 %v872_v6, %v2293_v39 }
 0x427   :  { %1653 = vpow2.f32 %v1025_v12  ;;  %v2423_v8 = vadd.f32 %v2414_v33, %v1646_v14  ;;  %v1139_v12 = vmul.f32 1.442695, %v1126_v43  ;;  %v899_v34 = vsel %vm896_vm9, %v897_v54, %v898_v50 }
 0x428   :  { %v2417_v9 = vmax.f32 %v884_v32, %v905_v46  ;;  %994 = vperm.xlu1 %1596, %v1646_v14   ;;  %v886_v41 = vmax.f32 %v878_v60, %v2290_v5  ;;  %v1352_v30 = vrot.slane %v2341_v26, 4  ;;  %v908_v38 = vsel %vm896_vm9, %v906_v62, %v907_v42 }
 0x429   :  { %v2438_v2 = vmax.f32 %v880_v61, %v899_v34  ;;  %1655 = vpow2.f32 %v1139_v12  ;;  %v1247_v43 = vmul.f32 1.442695, %v1234_v17  ;;  %v1128_v26 = vsub.f32 %v2259_v57, %v2345_v51 }
 0x42a   :  { %v1017_v7 = vsub.f32 %v2249_v16, %v2417_v9  ;;  %v1351_v49 = vrot.slane %v2417_v9, 4  ;;  %v2443_v50 = vmax.f32 %v886_v41, %v908_v38  ;;  %v1236_v14 = vsub.f32 %v2303_v27, %v2345_v51 }
 0x42b   :  { %v1131_v18 = vmul.f32 1.442695, %v1122_v45  ;;  %v1121_v54 = vsub.f32 %v2267_v23, %v2438_v2  ;;  %v1143_v57 = vmul.f32 1.442695, %v1128_v26  ;;  %v1355_v61 = vrot.slane %v2345_v51, 4 }
 0x42c   :  { %v1029_v15 = vmul.f32 1.442695, %v1017_v7  ;;  %v1353_v16 = vsel %vm896_vm9, %v1351_v49, %v1352_v30  ;;  %v1019_v13 = vsub.f32 %v2253_v59, %v2443_v50  ;;  %v1354_v59 = vrot.slane %v2443_v50, 4 }
 0x42d   :  { %v1370_v42 = vsub.f32 %v2320_v31, %v1353_v16  ;;  %v1251_v27 = vmul.f32 1.442695, %v1236_v14  ;;  %v1123_v23 = vsub.f32 %v2257_v52, %v2324_v36  ;;  %v1129_v12 = vmul.f32 1.442695, %v1121_v54 }
 0x42e   :  { %1657 = vpow2.f32 %v1029_v15  ;;  %v1033_v62 = vmul.f32 1.442695, %v1019_v13  ;;  %v1356_v17 = vsel %vm896_vm9, %v1354_v59, %v1355_v61  ;;  %v1125_v41 = vsub.f32 %v2261_v20, %v2417_v9 }
 0x42f   :  { %v1383_v6 = vmul.f32 1.442695, %v1370_v42  ;;  %1659 = vpow2.f32 %v1247_v43  ;;  %v1372_v34 = vsub.f32 %v2331_v22, %v1356_v17  ;;  %v1133_v7 = vmul.f32 1.442695, %v1123_v23 }
 0x430   :  { %v1230_v38 = vsub.f32 %v2286_v25, %v2362_v28  ;;  %v1137_v22 = vmul.f32 1.442695, %v1125_v41  ;;  %v1127_v45 = vsub.f32 %v2265_v37, %v2443_v50  ;;  %v1345_v15 = vrot.slane %v2438_v2, 4 }
 0x431   :  { %1661 = vpow2.f32 %v1383_v6  ;;  %v1387_v51 = vmul.f32 1.442695, %v1372_v34  ;;  %v1346_v25 = vrot.slane %v2362_v28, 4  ;;  %v1229_v37 = vsub.f32 %v2293_v39, %v2438_v2 }
 0x432   :  { %v1650_v32 = vpop.eup %1649  ;;  %1663 = vpow2.f32 %v1131_v18  ;;  %v1141_v26 = vmul.f32 1.442695, %v1127_v45  ;;  %v927_v28 = vsub.f32 %v2222_v63, %v2324_v36  ;;  %v1231_v39 = vsub.f32 %v2296_v3, %v2324_v36 }
 0x433   :  { %964 = vperm.xlu0 %1595, %v1650_v32   ;;  %v1652_v46 = vpop.eup %1651  ;;  %1665 = vpow2.f32 %v1033_v62  ;;  %v1347_v13 = vsel %vm896_vm9, %v1345_v15, %v1346_v25  ;;  %v1365_v54 = vsub.f32 %v2308_v1, %v1345_v15  ;;  %v931_v34 = vsub.f32 %v2228_v11, %v2443_v50 }
 0x434   :  { %v2454_v60 = vpop.eup %1653  ;;  %v2456_v31 = vadd.f32 %v1652_v46, %v1650_v32  ;;  %1052 = vperm.xlu1 %1596, %v1652_v46   ;;  %1667 = vpow2.f32 %v1143_v57  ;;  %v1239_v32 = vmul.f32 1.442695, %v1230_v38  ;;  %v1237_v46 = vmul.f32 1.442695, %v1229_v37 }
 0x435   :  { %1669 = vpow2.f32 %v1251_v27  ;;  %v1366_v36 = vsub.f32 %v2358_v40, %v1347_v13  ;;  %v937_v57 = vmul.f32 1.442695, %v927_v28  ;;  %v1241_v61 = vmul.f32 1.442695, %v1231_v39 }
 0x436   :  { %1671 = vpow2.f32 %v1129_v12  ;;  %v1656_v52 = vpop.eup %1655  ;;  %v1373_v23 = vmul.f32 1.442695, %v1365_v54  ;;  %v1233_v40 = vsub.f32 %v2288_v58, %v2417_v9  ;;  %v1369_v41 = vsub.f32 %v2376_v29, %v1351_v49 }
 0x437   :  { %1057 = vperm.xlu0 %1595, %v2454_v60   ;;  %1673 = vpow2.f32 %v1387_v51  ;;  %v1375_v12 = vmul.f32 1.442695, %v1366_v36 }
 0x438   :  { %1062 = vperm.xlu1 %1596, %v2364_v24   ;;  %1675 = vpow2.f32 %v1133_v7  ;;  %v1150_v24 = vadd.f32 %v1656_v52, %v2401_v48  ;;  %v1013_v48 = vsub.f32 %v2263_v21, %v2438_v2  ;;  %v1245_v51 = vmul.f32 1.442695, %v1233_v40 }
 0x439   :  { %1677 = vpow2.f32 %v1137_v22  ;;  %v1235_v7 = vsub.f32 %v2290_v5, %v2443_v50  ;;  %v1371_v5 = vsub.f32 %v2403_v19, %v1354_v59 }
 0x43a   :  { %v1021_v18 = vmul.f32 1.442695, %v1013_v48  ;;  %1679 = vpow2.f32 %v1239_v32 }
 0x43b   :  { %v2471_v30 = vpop.eup %1657  ;;  %1681 = vpow2.f32 %v1141_v26  ;;  %v1249_v22 = vmul.f32 1.442695, %v1235_v7  ;;  %v1385_v45 = vmul.f32 1.442695, %v1371_v5 }
 0x43c   :  { %1072 = vperm.xlu1 %1596, %v2389_v53   ;;  %1067 = vperm.xlu0 %1595, %v2471_v30   ;;  %v2480_v20 = vpop.eup %1659  ;;  %v925_v53 = vsub.f32 %v2224_v47, %v2438_v2 }
 0x43e   :  { %v2486_v16 = vpop.eup %1661  ;;  %v933_v2 = vmul.f32 1.442695, %v925_v53 }
 0x43f   :  { %v2492_v43 = vpop.eup %1663  ;;  %v1404_v47 = vrot.slane %v2486_v16, 4 }
 0x440   :  { %1082 = vperm.xlu1 %1596, %v2414_v33   ;;  %v1258_v33 = vadd.f32 %v2480_v20, %v1150_v24  ;;  %v2496_v42 = vpop.eup %1665  ;;  %1683 = vpow2.f32 %v933_v2  ;;  %v1381_v24 = vmul.f32 1.442695, %v1369_v41 }
 0x441   :  { %v1668_v21 = vpop.eup %1667  ;;  %1077 = vperm.xlu0 %1595, %v2496_v42   ;;  %1685 = vpow2.f32 %v1021_v18 }
 0x442   :  { %v2506_v14 = vadd.f32 %v1404_v47, %v1258_v33  ;;  %v1152_v6 = vadd.f32 %v1668_v21, %v2423_v8  ;;  %v2510_v63 = vpop.eup %1669  ;;  %v929_v8 = vsub.f32 %v2226_v10, %v2417_v9  ;;  %1687 = vpow2.f32 %v1237_v46 }
 0x443   :  { %v1672_v3 = vpop.eup %1671  ;;  %1689 = vpow2.f32 %v937_v57 }
 0x444   :  { %1160 = vperm.xlu1 %1596, %v2492_v43   ;;  %v2515_v62 = vpop.eup %1673  ;;  %v1260_v27 = vadd.f32 %v2510_v63, %v1152_v6  ;;  %1691 = vpow2.f32 %v1241_v61  ;;  %v941_v10 = vmul.f32 1.442695, %v929_v8 }
 0x445   :  { %1155 = vperm.xlu0 %1595, %v1672_v3   ;;  %v1407_v1 = vrot.slane %v2515_v62, 4  ;;  %1693 = vpow2.f32 %v1373_v23 }
 0x446   :  { %1695 = vpow2.f32 %v1375_v12 }
 0x447   :  { %v2525_v17 = vadd.f32 %v1407_v1, %v1260_v27  ;;  %1697 = vpow2.f32 %v941_v10 }
 0x448   :  { %1170 = vperm.xlu1 %1596, %v2373_v0   ;;  %v1676_v0 = vpop.eup %1675  ;;  %1699 = vpow2.f32 %v1245_v51 }
 0x449   :  { %1165 = vperm.xlu0 %1595, %v1676_v0   ;;  %v1678_v58 = vpop.eup %1677 }
 0x44a   :  { %v2534_v38 = vpop.eup %1679 }
 0x44b   :  { %v1682_v11 = vpop.eup %1681 }
 0x44c   :  { %1180 = vperm.xlu1 %1596, %v1656_v52   ;;  %v945_v52 = vmul.f32 1.442695, %v931_v34 }
 0x44d   :  { %1175 = vperm.xlu0 %1595, %v1678_v58   ;;  %v1684_v9 = vpop.eup %1683 }
 0x44e   :  { %1701 = vpow2.f32 %v945_v52  ;;  %v1686_v29 = vpop.eup %1685 }
 0x44f   :  { %1703 = vpow2.f32 %v1249_v22  ;;  %v1688_v49 = vpop.eup %1687  ;;  %v1037_v25 = vadd.f32 %v1686_v29, %v1684_v9 }
 0x450   :  { %1190 = vperm.xlu1 %1596, %v1668_v21   ;;  %1705 = vpow2.f32 %v1381_v24  ;;  %v1690_v53 = vpop.eup %1689 }
 0x451   :  { %1185 = vperm.xlu0 %1595, %v1682_v11   ;;  %v1692_v15 = vpop.eup %1691  ;;  %1707 = vpow2.f32 %v1385_v45  ;;  %v1039_v59 = vadd.f32 %v1690_v53, %v2454_v60  ;;  %v1145_v37 = vadd.f32 %v1672_v3, %v1037_v25 }
 0x452   :  { %v1694_v48 = vpop.eup %1693 }
 0x453   :  { %v1696_v19 = vpop.eup %1695  ;;  %v1397_v33 = vrot.slane %v1694_v48, 4  ;;  %v1147_v28 = vadd.f32 %v1676_v0, %v1039_v59  ;;  %v1253_v21 = vadd.f32 %v1688_v49, %v1145_v37 }
 0x454   :  { %1268 = vperm.xlu1 %1596, %v2534_v38   ;;  %v1698_v50 = vpop.eup %1697  ;;  %v1398_v26 = vrot.slane %v1696_v19, 4 }
 0x455   :  { %1263 = vperm.xlu0 %1595, %v1688_v49   ;;  %v1700_v32 = vpop.eup %1699  ;;  %v1041_v39 = vadd.f32 %v1698_v50, %v2471_v30  ;;  %v1255_v18 = vadd.f32 %v1692_v15, %v1147_v28 }
 0x457   :  { %v1149_v6 = vadd.f32 %v1678_v58, %v1041_v39  ;;  %v1419_v3 = vadd.f32 %v2396_v56, %v1255_v18 }
 0x458   :  { %1278 = vperm.xlu1 %1596, %v2378_v4  }
 0x459   :  { %1273 = vperm.xlu0 %1595, %v1692_v15   ;;  %v1257_v36 = vadd.f32 %v1700_v32, %v1149_v6 }
 0x45b   :  { %v1702_v4 = vpop.eup %1701 }
 0x45c   :  { %1288 = vperm.xlu1 %1596, %v2480_v20   ;;  %v1704_v2 = vpop.eup %1703  ;;  %v1399_v20 = vsel %vm896_vm9, %v1397_v33, %v1398_v26  ;;  %v1043_v46 = vadd.f32 %v1702_v4, %v2496_v42  ;;  %v1146_v42 = vadd.f32 %v2492_v43, %v2456_v31 }
 0x45d   :  { %1283 = vperm.xlu0 %1595, %v1700_v32   ;;  %v1706_v13 = vpop.eup %1705  ;;  %v1417_v60 = vadd.f32 %v1399_v20, %v1253_v21 }
 0x45e   :  { %v1403_v54 = vrot.slane %v1706_v13, 4  ;;  %v1151_v30 = vadd.f32 %v1682_v11, %v1043_v46  ;;  %v1254_v23 = vadd.f32 %v2534_v38, %v1146_v42  ;;  %v2580_v38 = vld [vmem:[%s2782_s0 + $0x28] sm:$0xff] }
 0x45f   :  { %1709 = vrcp.f32 %v1417_v60  ;;  %v1092_v22 = vrot.slane %v2580_v38, 1 }
 0x460   :  { %1298 = vperm.xlu1 %1596, %v2510_v63   ;;  %v1708_v63 = vpop.eup %1707  ;;  %v1405_v57 = vsel %vm896_vm9, %v1403_v54, %v1404_v47  ;;  %1711 = vrcp.f32 %v1419_v3  ;;  %v1259_v27 = vadd.f32 %v1704_v2, %v1151_v30  ;;  %v1418_v40 = vadd.f32 %v1398_v26, %v1254_v23  ;;  %v1728_v30 = vld [vmem:[%s2782_s0 + $0x10] sm:$0xff]  ;;  %v2647_v23 = vld [vmem:[%s2782_s0 + $0x8] sm:$0xff] }
 0x461   :  { %1293 = vperm.xlu0 %1595, %v1704_v2   ;;  %v1406_v61 = vrot.slane %v1708_v63, 4  ;;  %v1421_v8 = vadd.f32 %v1405_v57, %v1257_v36  ;;  %v1088_v57 = vrot.slane %v1728_v30, 1 }
 0x463   :  { %v1408_v56 = vsel %vm896_vm9, %v1406_v61, %v1407_v1  ;;  %1713 = vrcp.f32 %v1421_v8  ;;  %v2635_v61 = vld [vmem:[%s2782_s0 + $0x20] sm:$0xff] }
 0x464   :  { %959 = vperm.xlu1 %1596, %v1684_v9   ;;  %v1423_v47 = vadd.f32 %v1408_v56, %v1259_v27  ;;  %v1091_v42 = vrot.slane %v2635_v61, 1  ;;  %v2641_v27 = vld [vmem:[%s2782_s0 + $0x30] sm:$0xff] }
 0x465   :  { %1426 = vperm.xlu0 %1595, %v1694_v48   ;;  %v1094_v56 = vrot.slane %v2641_v27, 1 }
 0x466   :  { %1715 = vrcp.f32 %v1423_v47  ;;  %v2787_v47 = vrot.slane %v2647_v23, 2 }
 0x467   :  { %1717 = vrcp.f32 %v1418_v40  ;;  %v1732_v40 = vld [vmem:[%s2782_s0] sm:$0xff] }
 0x468   :  { %969 = vperm.xlu1 %1596, %v1690_v53   ;;  %1719 = vrcp.f32 %v2398_v55 }
 0x469   :  { %1434 = vperm.xlu0 %1595, %v2380_v35   ;;  %1721 = vrcp.f32 %v2506_v14 }
 0x46a   :  { %1723 = vrcp.f32 %v2525_v17 }
 0x46c   :  { %979 = vperm.xlu1 %1596, %v1698_v50   ;;  %v1710_v35 = vpop.eup %1709 }
 0x46d   :  { %1442 = vperm.xlu0 %1595, %v1706_v13   ;;  %v1712_v31 = vpop.eup %1711 }
 0x470   :  { %989 = vperm.xlu1 %1596, %v1702_v4   ;;  %v1714_v43 = vpop.eup %1713 }
 0x471   :  { %1450 = vperm.xlu0 %1595, %v1708_v63  }
 0x473   :  { %v1716_v1 = vpop.eup %1715 }
 0x474   :  { %1047 = vperm.xlu1 %1596, %v1686_v29   ;;  %v1718_v0 = vpop.eup %1717  ;;  %v2589_v29 = vld [vmem:[%s2782_s0 + $0x38] sm:$0xff] }
 0x475   :  { %1519 = vperm.xlu0 %1595, %v1710_v35   ;;  %v1720_v12 = vpop.eup %1719  ;;  %v1095_v49 = vrot.slane %v2589_v29, 1  ;;  %v1193_v35 = vrot.slane %v1732_v40, 2 }
 0x478   :  { %1430 = vperm.xlu1 %1596, %v1696_v19  }
 0x479   :  { %1529 = vperm.xlu0 %1595, %v1712_v31   ;;  %v1085_v31 = vrot.slane %v1732_v40, 1 }
 0x47c   :  { %1438 = vperm.xlu1 %1596, %v2383_v44   ;;  %v1722_v44 = vpop.eup %1721 }
 0x47d   :  { %1539 = vperm.xlu0 %1595, %v1714_v43   ;;  %v1724_v10 = vpop.eup %1723  ;;  %v1086_v43 = vrot.slane %v2647_v23, 1 }
 0x480   :  { %1446 = vperm.xlu1 %1596, %v2486_v16  }
 0x481   :  { %1549 = vperm.xlu0 %1595, %v1716_v1   ;;  %v2788_v1 = vrot.slane %v2647_v23, 3 }
 0x484   :  { %1454 = vperm.xlu1 %1596, %v2515_v62   ;;  %v2571_v62 = vld [vmem:[%s2782_s0 + $0x18] sm:$0xff] }
 0x485   :  { %v1089_v17 = vrot.slane %v2571_v62, 1 }
 0x488   :  { %1524 = vperm.xlu1 %1596, %v1718_v0   ;;  %v1301_v0 = vrot.slane %v1732_v40, 3 }
 0x48c   :  { %1534 = vperm.xlu1 %1596, %v1720_v12  }
 0x490   :  { %1544 = vperm.xlu1 %1596, %v1722_v44   ;;  %v1090_v44 = vsel %vm389_vm6, %v1088_v57, %v1089_v17 }
 0x494   :  { %1554 = vperm.xlu1 %1596, %v1724_v10   ;;  %v1093_v10 = vsel %vm389_vm6, %v1091_v42, %v1092_v22 }
 0x499   :  { %v975_v55 = vpop.permute.xlu1 %974 }
 0x49a   :  { %v1000_v58 = vmul.f32 %v2571_v62, %v975_v55 }
 0x49f   :  { %v985_v34 = vpop.permute.xlu1 %984 }
 0x4a0   :  { %v1002_v5 = vmul.f32 %v2580_v38, %v985_v34  ;;  %v1096_v34 = vsel %vm389_vm6, %v1094_v56, %v1095_v49 }
 0x4a3   :  { %v995_v16 = vpop.permute.xlu1 %994 }
 0x4a4   :  { %v1004_v25 = vmul.f32 %v2589_v29, %v995_v16  ;;  %v1195_v16 = vsel %vm410_vm0, %v1193_v35, %v2787_v47  ;;  %v1307_v47 = vrot.slane %v2635_v61, 3 }
 0x4ae   :  { %v2564_v51 = vpop.permute.xlu0 %964 }
 0x4af   :  { %v2566_v14 = vpop.permute.xlu1 %1052 }
 0x4b2   :  { %v2575_v52 = vpop.permute.xlu0 %1057 }
 0x4b3   :  { %v1063_v7 = vpop.permute.xlu1 %1062 }
 0x4b4   :  { %v1108_v41 = vmul.f32 %v1089_v17, %v1063_v7  ;;  %v1197_v7 = vrot.slane %v2571_v62, 2 }
 0x4b6   :  { %v2583_v11 = vadd.f32 %v1108_v41, %v1000_v58  ;;  %v1087_v58 = vsel %vm389_vm6, %v1085_v31, %v1086_v43  ;;  %v1196_v41 = vrot.slane %v1728_v30, 2  ;;  %v1107_v31 = vmul.f32 %v1090_v44, %v2575_v52 }
 0x4b7   :  { %v1073_v24 = vpop.permute.xlu1 %1072  ;;  %v2594_v53 = vpop.permute.xlu0 %1067 }
 0x4b8   :  { %v1110_v9 = vmul.f32 %v1092_v22, %v1073_v24  ;;  %v1202_v22 = vrot.slane %v2641_v27, 2  ;;  %v1310_v24 = vrot.slane %v2641_v27, 3 }
 0x4ba   :  { %v2592_v45 = vadd.f32 %v1110_v9, %v1002_v5  ;;  %v1199_v5 = vrot.slane %v2635_v61, 2  ;;  %v1303_v9 = vsel %vm447_vm1, %v1301_v0, %v2788_v1 }
 0x4bb   :  { %v1083_v15 = vpop.permute.xlu1 %1082 }
 0x4bc   :  { %v1112_v48 = vmul.f32 %v1095_v49, %v1083_v15  ;;  %v2601_v59 = vpop.permute.xlu0 %1077 }
 0x4be   :  { %v2597_v19 = vadd.f32 %v1112_v48, %v1004_v25  ;;  %v1304_v48 = vrot.slane %v1728_v30, 3 }
 0x4bf   :  { %v2599_v50 = vpop.permute.xlu1 %1160 }
 0x4c0   :  { %2789 = vst [vmem:[#allocation2_spill] sm:$0xff] %v2597_v19  ;;  %v1156_v32 = vpop.permute.xlu0 %1155 }
 0x4c1   :  { %v1213_v0 = vmul.f32 %v1195_v16, %v1156_v32  ;;  %v2792_v32 = vrot.slane %v2571_v62, 3 }
 0x4c3   :  { %v2603_v37 = vpop.permute.xlu1 %1170  ;;  %v1306_v16 = vsel %vm447_vm1, %v1304_v48, %v2792_v32 }
 0x4c4   :  { %v2607_v26 = vpop.permute.xlu0 %1165 }
 0x4c7   :  { %v2605_v33 = vpop.permute.xlu1 %1180 }
 0x4c8   :  { %v2611_v28 = vpop.permute.xlu0 %1175 }
 0x4cb   :  { %v2609_v4 = vpop.permute.xlu1 %1190 }
 0x4cc   :  { %v2615_v39 = vpop.permute.xlu0 %1185 }
 0x4cf   :  { %v2613_v21 = vpop.permute.xlu1 %1268 }
 0x4d0   :  { %v1264_v20 = vpop.permute.xlu0 %1263 }
 0x4d1   :  { %v1321_v19 = vmul.f32 %v1303_v9, %v1264_v20 }
 0x4d3   :  { %v2617_v2 = vpop.permute.xlu1 %1278 }
 0x4d4   :  { %v2621_v18 = vpop.permute.xlu0 %1273 }
 0x4d7   :  { %v2619_v13 = vpop.permute.xlu1 %1288 }
 0x4d8   :  { %v2625_v6 = vpop.permute.xlu0 %1283 }
 0x4db   :  { %v2623_v60 = vpop.permute.xlu1 %1298 }
 0x4dc   :  { %v2627_v54 = vpop.permute.xlu0 %1293 }
 0x4df   :  { %v960_v46 = vpop.permute.xlu1 %959 }
 0x4e0   :  { %v1427_v3 = vpop.permute.xlu0 %1426  ;;  %v997_v42 = vmul.f32 %v1732_v40, %v960_v46  ;;  %v2790_v46 = vrot.slane %v2580_v38, 2 }
 0x4e1   :  { %v1457_v1 = vmul.f32 %v1732_v40, %v1427_v3 }
 0x4e2   :  { %v1201_v57 = vsel %vm410_vm0, %v1199_v5, %v2790_v46  ;;  %v1109_v5 = vmul.f32 %v1093_v10, %v2594_v53 }
 0x4e3   :  { %v970_v63 = vpop.permute.xlu1 %969  ;;  %v1473_v9 = vrot.slane %v1457_v1, 4 }
 0x4e4   :  { %v1435_v8 = vpop.permute.xlu0 %1434  ;;  %v999_v15 = vmul.f32 %v1728_v30, %v970_v63  ;;  %v1198_v63 = vsel %vm410_vm0, %v1196_v41, %v1197_v7 }
 0x4e6   :  { %v1115_v44 = vadd.f32 %v1107_v31, %v999_v15 }
 0x4e7   :  { %v980_v36 = vpop.permute.xlu1 %979 }
 0x4e8   :  { %v1443_v55 = vpop.permute.xlu0 %1442 }
 0x4eb   :  { %v990_v12 = vpop.permute.xlu1 %989 }
 0x4ec   :  { %v2672_v56 = vpop.permute.xlu0 %1450 }
 0x4ef   :  { %v1048_v25 = vpop.permute.xlu1 %1047 }
 0x4f0   :  { %v1105_v35 = vmul.f32 %v1087_v58, %v1048_v25  ;;  %v2791_v58 = vrot.slane %v2589_v29, 2  ;;  %v1001_v25 = vmul.f32 %v2635_v61, %v980_v36  ;;  %v1520_v3 = vpop.permute.xlu0 %1519  ;;  %v2794_v36 = vrot.slane %v2589_v29, 3 }
 0x4f2   :  { %v1113_v49 = vadd.f32 %v1105_v35, %v997_v42  ;;  %v1204_v52 = vsel %vm410_vm0, %v1202_v22, %v2791_v58  ;;  %v1215_v42 = vmul.f32 %v1198_v63, %v2607_v26  ;;  %v2793_v22 = vrot.slane %v2580_v38, 3 }
 0x4f3   :  { %v1431_v17 = vpop.permute.xlu1 %1430  ;;  %v1312_v20 = vsel %vm447_vm1, %v1310_v24, %v2794_v36  ;;  %v1459_v35 = vmul.f32 %v1728_v30, %v1435_v8  ;;  %v1106_v26 = vmul.f32 %v1086_v43, %v2566_v14  ;;  %v1111_v30 = vmul.f32 %v1096_v34, %v2601_v59 }
 0x4f4   :  { %v1221_v41 = vadd.f32 %v1213_v0, %v1113_v49  ;;  %v2692_v40 = vmul.f32 %v2647_v23, %v1431_v17  ;;  %v1309_v15 = vsel %vm447_vm1, %v1307_v47, %v2793_v22  ;;  %v1223_v31 = vadd.f32 %v1215_v42, %v1115_v44  ;;  %v1530_v43 = vpop.permute.xlu0 %1529 }
 0x4f5   :  { %v1117_v17 = vadd.f32 %v1109_v5, %v1001_v25  ;;  %v1003_v0 = vmul.f32 %v2641_v27, %v990_v12  ;;  %v998_v47 = vmul.f32 %v2647_v23, %v2564_v51  ;;  %v1323_v8 = vmul.f32 %v1306_v16, %v2621_v18 }
 0x4f6   :  { %v1329_v48 = vadd.f32 %v1321_v19, %v1221_v41  ;;  %v1474_v49 = vrot.slane %v2692_v40, 4  ;;  %v1217_v19 = vmul.f32 %v1201_v57, %v2611_v28  ;;  %v2795_v12 = vrot.slane %v2647_v23, 2 }
 0x4f7   :  { %v1439_v53 = vpop.permute.xlu1 %1438  ;;  %v1476_v46 = vrot.slane %v1459_v35, 4  ;;  %v1461_v14 = vmul.f32 %v2635_v61, %v1443_v55  ;;  %v1331_v58 = vadd.f32 %v1323_v8, %v1223_v31  ;;  %v1119_v25 = vadd.f32 %v1111_v30, %v1003_v0 }
 0x4f8   :  { %v1475_v10 = vsel %vm896_vm9, %v1473_v9, %v1474_v49  ;;  %v1460_v24 = vmul.f32 %v2571_v62, %v1439_v53  ;;  %v1214_v63 = vmul.f32 %v2795_v12, %v2599_v50  ;;  %v1225_v44 = vadd.f32 %v1217_v19, %v1117_v17 }
 0x4f9   :  { %v1493_v1 = vadd.f32 %v1475_v10, %v1329_v48  ;;  %v1114_v59 = vadd.f32 %v1106_v26, %v998_v47  ;;  %v2796_v28 = vrot.slane %v2647_v23, 3  ;;  %v1216_v50 = vmul.f32 %v1197_v7, %v2603_v37 }
 0x4fa   :  { %v1477_v51 = vrot.slane %v1460_v24, 4  ;;  %v1219_v61 = vmul.f32 %v1204_v52, %v2615_v39  ;;  %v1325_v55 = vmul.f32 %v1309_v15, %v2625_v6  ;;  %v2797_v39 = vrot.slane %v2571_v62, 3  ;;  %v1540_v52 = vpop.permute.xlu0 %1539 }
 0x4fb   :  { %v1557_v32 = vmul.f32 %v1520_v3, %v1493_v1  ;;  %v1447_v41 = vpop.permute.xlu1 %1446  ;;  %v1322_v18 = vmul.f32 %v2796_v28, %v2613_v21  ;;  %v1222_v23 = vadd.f32 %v1214_v63, %v1114_v59  ;;  %v1479_v21 = vrot.slane %v1461_v14, 4 }
 0x4fc   :  { %v1478_v34 = vsel %vm896_vm9, %v1476_v46, %v1477_v51  ;;  %v1462_v57 = vmul.f32 %v2580_v38, %v1447_v41  ;;  %v1463_v3 = vmul.f32 %v2641_v27, %v2672_v56  ;;  %v1333_v5 = vadd.f32 %v1325_v55, %v1225_v44 }
 0x4fd   :  { %1566 = vst.msk [vmem:[%s2786_s4] sm:$0xff] %vm1565_vm10, %v1557_v32  ;;  %v1495_v16 = vadd.f32 %v1478_v34, %v1331_v58  ;;  %v1227_v42 = vadd.f32 %v1219_v61, %v1119_v25  ;;  %v1330_v7 = vadd.f32 %v1322_v18, %v1222_v23  ;;  %v1324_v6 = vmul.f32 %v2797_v39, %v2617_v2 }
 0x4fe   :  { %v1480_v40 = vrot.slane %v1462_v57, 4  ;;  %v1224_v9 = vadd.f32 %v1216_v50, %v2583_v11  ;;  %v1327_v35 = vmul.f32 %v1312_v20, %v2627_v54  ;;  %v2798_v56 = vrot.slane %v2580_v38, 2  ;;  %v1550_v30 = vpop.permute.xlu0 %1549 }
 0x4ff   :  { %v1559_v22 = vmul.f32 %v1530_v43, %v1495_v16  ;;  %v1455_v37 = vpop.permute.xlu1 %1454  ;;  %v1482_v2 = vrot.slane %v1463_v3, 4  ;;  %v1494_v31 = vadd.f32 %v1474_v49, %v1330_v7  ;;  %v2799_v54 = vrot.slane %v2580_v38, 3 }
 0x500   :  { %v1481_v15 = vsel %vm896_vm9, %v1479_v21, %v1480_v40  ;;  %v1464_v36 = vmul.f32 %v2589_v29, %v1455_v37  ;;  %v1218_v62 = vmul.f32 %v2798_v56, %v2605_v33  ;;  %v1335_v17 = vadd.f32 %v1327_v35, %v1227_v42 }
 0x501   :  { %1569 = vst.msk [vmem:[%s2786_s4 + $0x10] sm:$0xff] %vm1565_vm10, %v1559_v22  ;;  %v1497_v27 = vadd.f32 %v1481_v15, %v1333_v5  ;;  %v1332_v11 = vadd.f32 %v1324_v6, %v1224_v9  ;;  %v1326_v20 = vmul.f32 %v2799_v54, %v2619_v13  ;;  %v2800_v10 = vrot.slane %v2589_v29, 2 }
 0x502   :  { %v1483_v48 = vrot.slane %v1464_v36, 4  ;;  %v1226_v49 = vadd.f32 %v1218_v62, %v2592_v45  ;;  %v2801_v1 = vrot.slane %v2589_v29, 3  ;;  %v2802_v45 = vld [vmem:[#allocation2_spill] sm:$0xff] }
 0x503   :  { %v1561_v0 = vmul.f32 %v1540_v52, %v1497_v27  ;;  %v1525_v53 = vpop.permute.xlu1 %1524  ;;  %v1220_v24 = vmul.f32 %v2800_v10, %v2609_v4  ;;  %v1496_v38 = vadd.f32 %v1477_v51, %v1332_v11 }
 0x504   :  { %v1484_v26 = vsel %vm896_vm9, %v1482_v2, %v1483_v48  ;;  %v1558_v47 = vmul.f32 %v1525_v53, %v1494_v31  ;;  %v1334_v8 = vadd.f32 %v1326_v20, %v1226_v49  ;;  %v1328_v12 = vmul.f32 %v2801_v1, %v2623_v60 }
 0x505   :  { %1571 = vst.msk [vmem:[%s2786_s4 + $0x20] sm:$0xff] %vm1565_vm10, %v1561_v0  ;;  %v1499_v33 = vadd.f32 %v1484_v26, %v1335_v17  ;;  %v1228_v4 = vadd.f32 %v1220_v24, %v2802_v45 }
 0x506   :  { %1568 = vst.msk [vmem:[%s2786_s4 + $0x8] sm:$0xf] %vm1567_vm11, %v1558_v47  ;;  %v1498_v46 = vadd.f32 %v1480_v40, %v1334_v8 }
 0x507   :  { %v1563_v13 = vmul.f32 %v1550_v30, %v1499_v33  ;;  %v1535_v19 = vpop.permute.xlu1 %1534  ;;  %v1336_v43 = vadd.f32 %v1328_v12, %v1228_v4 }
 0x508   :  { %v1560_v63 = vmul.f32 %v1535_v19, %v1496_v38 }
 0x509   :  { %1573 = vst.msk [vmem:[%s2786_s4 + $0x30] sm:$0xff] %vm1565_vm10, %v1563_v13  ;;  %v1500_v29 = vadd.f32 %v1483_v48, %v1336_v43 }
 0x50a   :  { %1570 = vst.msk [vmem:[%s2786_s4 + $0x18] sm:$0xf] %vm1567_vm11, %v1560_v63 }
 0x50b   :  { %v1545_v14 = vpop.permute.xlu1 %1544 }
 0x50c   :  { %v1562_v51 = vmul.f32 %v1545_v14, %v1498_v46 }
 0x50e   :  { %1572 = vst.msk [vmem:[%s2786_s4 + $0x28] sm:$0xf] %vm1567_vm11, %v1562_v51 }
 0x50f   :  { %v1555_v60 = vpop.permute.xlu1 %1554 }
 0x510   :  { %v1564_v58 = vmul.f32 %v1555_v60, %v1500_v29 }
 0x512   :  { %1574 = vst.msk [vmem:[%s2786_s4 + $0x38] sm:$0xf] %vm1567_vm11, %v1564_v58 }

</bundles_post_ra>
